<compile_context>
chip_gen: v7x
topology: tpu7x:2x2x1
jax: 0.10.0
libtpu: 0.0.40
codegen_flags: <defaults>
</compile_context>

<pallas_src>
import functools

import jax
import jax.numpy as jnp
import numpy as np
from jax import lax
from jax.experimental import pallas as pl
from jax.experimental.pallas import tpu as pltpu

KERNEL_SIZE = 7

_MAX_STATIC_CHUNKS = 16   # statically unroll the C-chunk loops up to this count
_SUBLANES_F32 = 8         # f32 sublanes per vreg -> batch-block target


def _spatial_attention_kernel(w_ref, rc_ref, x_ref, o_ref, *,
                              ksize, H, W, c_chunk, bf16_apply):
    """One grid step: `nb` batch elements in lane-dense (C, H*W) layout.

    w_ref  : SMEM (2*K*K,) f32     conv weights, flattened (in_ch, kh, kw)
    rc_ref : VMEM (2, HWp) int32   rc[0] = row index, rc[1] = col index per lane
    x_ref  : VMEM (nb, C, HWp)     input tile (lane dim padded to 128 multiple)
    o_ref  : VMEM (nb, C, HWp)     output tile
    """
    K = ksize
    p = K // 2
    f32 = jnp.float32

    nb, C, HWp = x_ref.shape
    n_full = C // c_chunk
    tail = C - n_full * c_chunk

    # ---------------- channel mean & max (all nb batches at once) ------------
    def reduce_chunk(carry, sl):
        s, m = carry
        xc = x_ref[:, sl, :].astype(f32)                       # (nb, cc, HWp)
        return s + jnp.sum(xc, axis=1), jnp.maximum(m, jnp.max(xc, axis=1))

    csum = jnp.zeros((nb, HWp), f32)
    cmax = jnp.full((nb, HWp), -jnp.inf, f32)
    if n_full <= _MAX_STATIC_CHUNKS:
        for ci in range(n_full):
            csum, cmax = reduce_chunk((csum, cmax), pl.ds(ci * c_chunk, c_chunk))
    else:
        def red_body(ci, carry):
            c0 = pl.multiple_of(ci * c_chunk, c_chunk)
            return reduce_chunk(carry, pl.ds(c0, c_chunk))
        csum, cmax = lax.fori_loop(0, n_full, red_body, (csum, cmax), unroll=2)
    if tail:
        csum, cmax = reduce_chunk((csum, cmax), pl.ds(n_full * c_chunk, tail))

    avg = csum * (1.0 / C)                                     # (nb, HWp) f32
    mx = cmax                                                  # (nb, HWp) f32

    # ---------------- separable KxK conv in roll space ------------------------
    # Tap (kh, kw) of the zero-padded conv reads flat offset (kh-p)*W + (kw-p).
    # Column shifts (+ column masks) are applied once per kw on both channel
    # maps and weighted into K per-row partial sums; each partial sum then gets
    # a single row roll + row mask at the output position.  Wrapped / padded
    # lane sources are always masked before they can reach a valid output.
    row = rc_ref[0:1, :]                                       # (1, HWp) int32
    col = rc_ref[1:2, :]                                       # (1, HWp) int32

    acc_kh = [None] * K
    for kw in range(K):
        dw = kw - p
        if dw == 0:
            cs_a, cs_m = avg, mx
        else:
            shift = (-dw) % HWp
            cmask = (col < (W - dw)) if dw > 0 else (col >= (-dw))
            cs_a = jnp.where(cmask, pltpu.roll(avg, shift, 1), 0.0)
            cs_m = jnp.where(cmask, pltpu.roll(mx, shift, 1), 0.0)
        for kh in range(K):
            t = w_ref[kh * K + kw] * cs_a + w_ref[K * K + kh * K + kw] * cs_m
            acc_kh[kh] = t if acc_kh[kh] is None else acc_kh[kh] + t

    acc = None
    for kh in range(K):
        dh = kh - p
        v = acc_kh[kh]
        if dh != 0:
            v = pltpu.roll(v, (-dh * W) % HWp, 1)
            rmask = (row < (H - dh)) if dh > 0 else (row >= (-dh))
            v = jnp.where(rmask, v, 0.0)
        acc = v if acc is None else acc + v

    attn = jax.nn.sigmoid(acc)                                 # (nb, HWp) f32

    # ---------------- apply attention, streamed over C chunks ----------------
    if bf16_apply:                     # native bf16 VALU path (v6e / v7x)
        attn_b = attn.astype(o_ref.dtype)[:, None, :]          # (nb, 1, HWp)

        def apply_chunk(sl):
            o_ref[:, sl, :] = (x_ref[:, sl, :] * attn_b).astype(o_ref.dtype)
    else:
        attn_b = attn[:, None, :]

        def apply_chunk(sl):
            o_ref[:, sl, :] = (x_ref[:, sl, :].astype(f32) * attn_b
                               ).astype(o_ref.dtype)

    if n_full <= _MAX_STATIC_CHUNKS:
        for ci in range(n_full):
            apply_chunk(pl.ds(ci * c_chunk, c_chunk))
    else:
        def app_body(ci, carry):
            c0 = pl.multiple_of(ci * c_chunk, c_chunk)
            apply_chunk(pl.ds(c0, c_chunk))
            return carry
        lax.fori_loop(0, n_full, app_body, 0, unroll=2)
    if tail:
        apply_chunk(pl.ds(n_full * c_chunk, tail))


def _device_kind():
    try:
        return jax.devices()[0].device_kind.lower()
    except Exception:
        return ""


def _pick_tiling(N, C, HW, itemsize):
    HWp = ((HW + 127) // 128) * 128
    kind = _device_kind()
    # 128-MiB-VMEM generations (v5e/v5p/v6e) get the big budgets; unknown parts
    # and v7x (64 MiB per TensorCore) stay at the conservative defaults.
    big_vmem = ("v5" in kind) or ("v6" in kind)
    multi_tc = any(t in kind for t in ("v4", "v5p", "v7"))
    vmem_limit = (64 if big_vmem else 32) * 1024 * 1024
    tile_budget = (48 if big_vmem else 24) * 1024 * 1024

    # Batch elements per grid step: target the 8 f32 sublanes of a vreg,
    # bounded by the double-buffered (in + out) tile VMEM footprint.
    per_batch = 2 * 2 * C * HWp * itemsize
    nb = min(N, _SUBLANES_F32, max(1, tile_budget // max(per_batch, 1)))
    if multi_tc and N >= 2:
        nb = min(nb, max(1, (N + 1) // 2))   # keep >= 2 "parallel" grid steps
    nb = max(1, nb)
    # TODO(synk): single-batch tiles that still exceed the budget (huge C*H*W)
    # need a two-pass C-tiled variant, and N == 1 on multi-TensorCore parts
    # needs a second parallel grid axis (C / spatial split) to fill both cores.

    # Channel chunk for the streamed reduce/apply stages: sublane-aligned
    # (multiple of 8) with a static tail, sized so the f32 chunk stays ~128 KiB.
    per_row = nb * HWp * 4
    max_c = max(1, (128 * 1024) // per_row)
    if C <= max_c:
        c_chunk = C
    elif max_c >= 8:
        c_chunk = (max_c // 8) * 8
    else:
        c_chunk = max_c
    return HWp, nb, c_chunk, vmem_limit


def spatial_attention(x, conv_weight):
    """x: (N, C, H, W); conv_weight: (1, 2, K, K). Returns sigmoid(conv([avg,max])) * x."""
    N, C, H, W = x.shape
    K = conv_weight.shape[-1]
    HW = H * W
    itemsize = jnp.dtype(x.dtype).itemsize
    HWp, nb, c_chunk, vmem_limit = _pick_tiling(N, C, HW, itemsize)

    # NCHW -> (N, C, H*W) is free (H, W contiguous).  No HBM-side pad / slice:
    # the BlockSpec lane dim is HWp (rounded up to a multiple of 128), so
    # Pallas pads the tail of each block on read and drops OOB writes.
    x3 = x.reshape(N, C, HW)
    w_flat = conv_weight.reshape(-1).astype(jnp.float32)          # (2*K*K,)

    # Per-lane (row, col) indices of the flattened HxW map (host-side; avoids
    # in-kernel integer division for non-power-of-two W).
    j = np.arange(HWp, dtype=np.int64)
    rc = jnp.asarray(np.stack([j // W, j % W]).astype(np.int32))  # (2, HWp)

    kind = _device_kind()
    bf16_apply = (x.dtype == jnp.bfloat16 and
                  "v5e" not in kind and "v5 lite" not in kind)

    kernel = functools.partial(_spatial_attention_kernel, ksize=K, H=H, W=W,
                               c_chunk=c_chunk, bf16_apply=bf16_apply)

    out3 = pl.pallas_call(
        kernel,
        out_shape=jax.ShapeDtypeStruct((N, C, HW), x.dtype),
        grid=(pl.cdiv(N, nb),),
        in_specs=[
            pl.BlockSpec(memory_space=pltpu.MemorySpace.SMEM),    # conv weights
            pl.BlockSpec((2, HWp), lambda i: (0, 0)),             # row/col lanes
            pl.BlockSpec((nb, C, HWp), lambda i: (i, 0, 0)),      # x tile
        ],
        out_specs=pl.BlockSpec((nb, C, HWp), lambda i: (i, 0, 0)),
        compiler_params=pltpu.CompilerParams(
            dimension_semantics=("parallel",),
            vmem_limit_bytes=vmem_limit,
        ),
        cost_estimate=pl.CostEstimate(
            flops=N * HW * (3 * C + 4 * K * K),
            transcendentals=N * HW,
            bytes_accessed=2 * N * C * HW * itemsize,
        ),
    )(w_flat, rc, x3)
    return out3.reshape(N, C, H, W)


def spatial_attention_ref(x, conv_weight):
    """Pure-JAX reference matching the PyTorch forward exactly."""
    pad = conv_weight.shape[-1] // 2
    avg = jnp.mean(x, axis=1, keepdims=True)
    mx = jnp.max(x, axis=1, keepdims=True)
    cat = jnp.concatenate([avg, mx], axis=1)                    # (N, 2, H, W)
    conv = lax.conv_general_dilated(
        cat, conv_weight, window_strides=(1, 1),
        padding=[(pad, pad), (pad, pad)],
        dimension_numbers=("NCHW", "OIHW", "NCHW"))
    return jax.nn.sigmoid(conv) * x


if __name__ == "__main__":
    key = jax.random.PRNGKey(0)
    k0, k1, k2, k3 = jax.random.split(key, 4)

    # Conv2d(2, 1, 7, bias=False) with kaiming_normal_(mode='fan_out',
    # nonlinearity='relu'): std = sqrt(2 / fan_out), fan_out = 1 * 7 * 7.
    fan_out = 1 * KERNEL_SIZE * KERNEL_SIZE
    std = float(np.sqrt(2.0 / fan_out))
    conv_weight = (jax.random.normal(k0, (1, 2, KERNEL_SIZE, KERNEL_SIZE),
                                     dtype=jnp.float32) * std)

    # 1) main case (module-sized): f32, H*W already a multiple of 128.
    x = jax.random.normal(k1, (2, 4, 16, 16), dtype=jnp.float32)
    out = jax.block_until_ready(spatial_attention(x, conv_weight))
    ref = spatial_attention_ref(x, conv_weight)
    np.testing.assert_allclose(np.asarray(out), np.asarray(ref),
                               rtol=5e-5, atol=5e-5)

    # 2) padded lanes (H*W % 128 != 0), ragged last batch block, chunked C
    #    reduce/apply with a non-multiple-of-8 tail chunk.
    x2 = jax.random.normal(k2, (10, 40, 12, 12), dtype=jnp.float32)
    out2 = jax.block_until_ready(spatial_attention(x2, conv_weight))
    ref2 = spatial_attention_ref(x2, conv_weight)
    np.testing.assert_allclose(np.asarray(out2), np.asarray(ref2),
                               rtol=5e-5, atol=5e-5)

    # 3) bf16 input (bf16 apply-stage multiply on v6e/v7x, f32 math elsewhere).
    x3 = jax.random.normal(k3, (2, 8, 16, 16),
                           dtype=jnp.float32).astype(jnp.bfloat16)
    out3 = jax.block_until_ready(spatial_attention(x3, conv_weight))
    ref3 = spatial_attention_ref(x3.astype(jnp.float32), conv_weight)
    np.testing.assert_allclose(np.asarray(out3).astype(np.float32),
                               np.asarray(ref3), rtol=5e-2, atol=5e-2)

    print("KERNEL_OK")
</pallas_src>

<mosaic_0001>
module attributes {stable_mosaic.version = 11 : i64} {
  func.func @_spatial_attention_kernel(%arg0: i32, %arg1: memref<98xf32, #tpu.memory_space<smem>>, %arg2: memref<2x256xi32, #tpu.memory_space<vmem>>, %arg3: memref<2x4x256xf32, #tpu.memory_space<vmem>>, %arg4: memref<2x4x256xf32, #tpu.memory_space<vmem>>) attributes {dimension_semantics = [#tpu.dimension_semantics<parallel>], iteration_bounds = array<i64: 1>, scalar_prefetch = 0 : i64, scratch_operands = 0 : i64, tpu.core_type = #tpu.core_type<tc>, window_params = [{transform_indices = @transform_0, window_bounds = array<i64: 98>}, {pipeline_mode = #tpu.pipeline_mode<synchronous>, transform_indices = @transform_1, window_bounds = array<i64: 2, 256>}, {transform_indices = @transform_2, window_bounds = array<i64: 2, 4, 256>}, {transform_indices = @transform_3, window_bounds = array<i64: 2, 4, 256>}]} {
    %cst = arith.constant 0.000000e+00 : f32
    %0 = vector.broadcast %cst : f32 to vector<2x256xf32>
    %cst_0 = arith.constant 0xFF800000 : f32
    %1 = vector.broadcast %cst_0 : f32 to vector<2x256xf32>
    %c0 = arith.constant 0 : index
    %c0_1 = arith.constant 0 : index
    %c0_2 = arith.constant 0 : index
    %2 = vector.load %arg3[%c0, %c0_1, %c0_2] : memref<2x4x256xf32, #tpu.memory_space<vmem>>, vector<2x4x256xf32>
    %cst_3 = arith.constant dense<0.000000e+00> : vector<2x256xf32>
    %3 = vector.multi_reduction <add>, %2, %cst_3 [1] : vector<2x4x256xf32> to vector<2x256xf32>
    %4 = arith.addf %0, %3 : vector<2x256xf32>
    %cst_4 = arith.constant dense<0xFF800000> : vector<2x256xf32>
    %5 = vector.multi_reduction <maximumf>, %2, %cst_4 [1] : vector<2x4x256xf32> to vector<2x256xf32>
    %6 = arith.maximumf %1, %5 : vector<2x256xf32>
    %cst_5 = arith.constant 2.500000e-01 : f32
    %7 = vector.broadcast %cst_5 : f32 to vector<2x256xf32>
    %8 = arith.mulf %4, %7 : vector<2x256xf32>
    %c0_6 = arith.constant 0 : index
    %c0_7 = arith.constant 0 : index
    %9 = vector.load %arg2[%c0_6, %c0_7] : memref<2x256xi32, #tpu.memory_space<vmem>>, vector<1x256xi32>
    %c1 = arith.constant 1 : index
    %c0_8 = arith.constant 0 : index
    %10 = vector.load %arg2[%c1, %c0_8] : memref<2x256xi32, #tpu.memory_space<vmem>>, vector<1x256xi32>
    %c3_i32 = arith.constant 3 : i32
    %11 = vector.broadcast %c3_i32 : i32 to vector<1x256xi32>
    %12 = arith.cmpi sge, %10, %11 : vector<1x256xi32>
    %c3_i32_9 = arith.constant 3 : i32
    %13 = tpu.dynamic_rotate %8 by %c3_i32_9 dim 1 : vector<2x256xf32>, i32 -> vector<2x256xf32>
    %cst_10 = arith.constant 0.000000e+00 : f32
    %14 = vector.shape_cast %12 : vector<1x256xi1> to vector<1x256xi1>
    %15 = vector.broadcast %14 : vector<1x256xi1> to vector<2x256xi1>
    %16 = vector.broadcast %cst_10 : f32 to vector<2x256xf32>
    %17 = arith.select %15, %13, %16 : vector<2x256xi1>, vector<2x256xf32>
    %c3_i32_11 = arith.constant 3 : i32
    %18 = tpu.dynamic_rotate %6 by %c3_i32_11 dim 1 : vector<2x256xf32>, i32 -> vector<2x256xf32>
    %cst_12 = arith.constant 0.000000e+00 : f32
    %19 = vector.shape_cast %12 : vector<1x256xi1> to vector<1x256xi1>
    %20 = vector.broadcast %19 : vector<1x256xi1> to vector<2x256xi1>
    %21 = vector.broadcast %cst_12 : f32 to vector<2x256xf32>
    %22 = arith.select %20, %18, %21 : vector<2x256xi1>, vector<2x256xf32>
    %c0_13 = arith.constant 0 : index
    %23 = memref.load %arg1[%c0_13] : memref<98xf32, #tpu.memory_space<smem>>
    %24 = vector.broadcast %23 : f32 to vector<2x256xf32>
    %25 = arith.mulf %24, %17 : vector<2x256xf32>
    %c49 = arith.constant 49 : index
    %26 = memref.load %arg1[%c49] : memref<98xf32, #tpu.memory_space<smem>>
    %27 = vector.broadcast %26 : f32 to vector<2x256xf32>
    %28 = arith.mulf %27, %22 : vector<2x256xf32>
    %29 = arith.addf %25, %28 : vector<2x256xf32>
    %c7 = arith.constant 7 : index
    %30 = memref.load %arg1[%c7] : memref<98xf32, #tpu.memory_space<smem>>
    %31 = vector.broadcast %30 : f32 to vector<2x256xf32>
    %32 = arith.mulf %31, %17 : vector<2x256xf32>
    %c56 = arith.constant 56 : index
    %33 = memref.load %arg1[%c56] : memref<98xf32, #tpu.memory_space<smem>>
    %34 = vector.broadcast %33 : f32 to vector<2x256xf32>
    %35 = arith.mulf %34, %22 : vector<2x256xf32>
    %36 = arith.addf %32, %35 : vector<2x256xf32>
    %c14 = arith.constant 14 : index
    %37 = memref.load %arg1[%c14] : memref<98xf32, #tpu.memory_space<smem>>
    %38 = vector.broadcast %37 : f32 to vector<2x256xf32>
    %39 = arith.mulf %38, %17 : vector<2x256xf32>
    %c63 = arith.constant 63 : index
    %40 = memref.load %arg1[%c63] : memref<98xf32, #tpu.memory_space<smem>>
    %41 = vector.broadcast %40 : f32 to vector<2x256xf32>
    %42 = arith.mulf %41, %22 : vector<2x256xf32>
    %43 = arith.addf %39, %42 : vector<2x256xf32>
    %c21 = arith.constant 21 : index
    %44 = memref.load %arg1[%c21] : memref<98xf32, #tpu.memory_space<smem>>
    %45 = vector.broadcast %44 : f32 to vector<2x256xf32>
    %46 = arith.mulf %45, %17 : vector<2x256xf32>
    %c70 = arith.constant 70 : index
    %47 = memref.load %arg1[%c70] : memref<98xf32, #tpu.memory_space<smem>>
    %48 = vector.broadcast %47 : f32 to vector<2x256xf32>
    %49 = arith.mulf %48, %22 : vector<2x256xf32>
    %50 = arith.addf %46, %49 : vector<2x256xf32>
    %c28 = arith.constant 28 : index
    %51 = memref.load %arg1[%c28] : memref<98xf32, #tpu.memory_space<smem>>
    %52 = vector.broadcast %51 : f32 to vector<2x256xf32>
    %53 = arith.mulf %52, %17 : vector<2x256xf32>
    %c77 = arith.constant 77 : index
    %54 = memref.load %arg1[%c77] : memref<98xf32, #tpu.memory_space<smem>>
    %55 = vector.broadcast %54 : f32 to vector<2x256xf32>
    %56 = arith.mulf %55, %22 : vector<2x256xf32>
    %57 = arith.addf %53, %56 : vector<2x256xf32>
    %c35 = arith.constant 35 : index
    %58 = memref.load %arg1[%c35] : memref<98xf32, #tpu.memory_space<smem>>
    %59 = vector.broadcast %58 : f32 to vector<2x256xf32>
    %60 = arith.mulf %59, %17 : vector<2x256xf32>
    %c84 = arith.constant 84 : index
    %61 = memref.load %arg1[%c84] : memref<98xf32, #tpu.memory_space<smem>>
    %62 = vector.broadcast %61 : f32 to vector<2x256xf32>
    %63 = arith.mulf %62, %22 : vector<2x256xf32>
    %64 = arith.addf %60, %63 : vector<2x256xf32>
    %c42 = arith.constant 42 : index
    %65 = memref.load %arg1[%c42] : memref<98xf32, #tpu.memory_space<smem>>
    %66 = vector.broadcast %65 : f32 to vector<2x256xf32>
    %67 = arith.mulf %66, %17 : vector<2x256xf32>
    %c91 = arith.constant 91 : index
    %68 = memref.load %arg1[%c91] : memref<98xf32, #tpu.memory_space<smem>>
    %69 = vector.broadcast %68 : f32 to vector<2x256xf32>
    %70 = arith.mulf %69, %22 : vector<2x256xf32>
    %71 = arith.addf %67, %70 : vector<2x256xf32>
    %c2_i32 = arith.constant 2 : i32
    %72 = vector.broadcast %c2_i32 : i32 to vector<1x256xi32>
    %73 = arith.cmpi sge, %10, %72 : vector<1x256xi32>
    %c2_i32_14 = arith.constant 2 : i32
    %74 = tpu.dynamic_rotate %8 by %c2_i32_14 dim 1 : vector<2x256xf32>, i32 -> vector<2x256xf32>
    %cst_15 = arith.constant 0.000000e+00 : f32
    %75 = vector.shape_cast %73 : vector<1x256xi1> to vector<1x256xi1>
    %76 = vector.broadcast %75 : vector<1x256xi1> to vector<2x256xi1>
    %77 = vector.broadcast %cst_15 : f32 to vector<2x256xf32>
    %78 = arith.select %76, %74, %77 : vector<2x256xi1>, vector<2x256xf32>
    %c2_i32_16 = arith.constant 2 : i32
    %79 = tpu.dynamic_rotate %6 by %c2_i32_16 dim 1 : vector<2x256xf32>, i32 -> vector<2x256xf32>
    %cst_17 = arith.constant 0.000000e+00 : f32
    %80 = vector.shape_cast %73 : vector<1x256xi1> to vector<1x256xi1>
    %81 = vector.broadcast %80 : vector<1x256xi1> to vector<2x256xi1>
    %82 = vector.broadcast %cst_17 : f32 to vector<2x256xf32>
    %83 = arith.select %81, %79, %82 : vector<2x256xi1>, vector<2x256xf32>
    %c1_18 = arith.constant 1 : index
    %84 = memref.load %arg1[%c1_18] : memref<98xf32, #tpu.memory_space<smem>>
    %85 = vector.broadcast %84 : f32 to vector<2x256xf32>
    %86 = arith.mulf %85, %78 : vector<2x256xf32>
    %c50 = arith.constant 50 : index
    %87 = memref.load %arg1[%c50] : memref<98xf32, #tpu.memory_space<smem>>
    %88 = vector.broadcast %87 : f32 to vector<2x256xf32>
    %89 = arith.mulf %88, %83 : vector<2x256xf32>
    %90 = arith.addf %86, %89 : vector<2x256xf32>
    %91 = arith.addf %29, %90 : vector<2x256xf32>
    %c8 = arith.constant 8 : index
    %92 = memref.load %arg1[%c8] : memref<98xf32, #tpu.memory_space<smem>>
    %93 = vector.broadcast %92 : f32 to vector<2x256xf32>
    %94 = arith.mulf %93, %78 : vector<2x256xf32>
    %c57 = arith.constant 57 : index
    %95 = memref.load %arg1[%c57] : memref<98xf32, #tpu.memory_space<smem>>
    %96 = vector.broadcast %95 : f32 to vector<2x256xf32>
    %97 = arith.mulf %96, %83 : vector<2x256xf32>
    %98 = arith.addf %94, %97 : vector<2x256xf32>
    %99 = arith.addf %36, %98 : vector<2x256xf32>
    %c15 = arith.constant 15 : index
    %100 = memref.load %arg1[%c15] : memref<98xf32, #tpu.memory_space<smem>>
    %101 = vector.broadcast %100 : f32 to vector<2x256xf32>
    %102 = arith.mulf %101, %78 : vector<2x256xf32>
    %c64 = arith.constant 64 : index
    %103 = memref.load %arg1[%c64] : memref<98xf32, #tpu.memory_space<smem>>
    %104 = vector.broadcast %103 : f32 to vector<2x256xf32>
    %105 = arith.mulf %104, %83 : vector<2x256xf32>
    %106 = arith.addf %102, %105 : vector<2x256xf32>
    %107 = arith.addf %43, %106 : vector<2x256xf32>
    %c22 = arith.constant 22 : index
    %108 = memref.load %arg1[%c22] : memref<98xf32, #tpu.memory_space<smem>>
    %109 = vector.broadcast %108 : f32 to vector<2x256xf32>
    %110 = arith.mulf %109, %78 : vector<2x256xf32>
    %c71 = arith.constant 71 : index
    %111 = memref.load %arg1[%c71] : memref<98xf32, #tpu.memory_space<smem>>
    %112 = vector.broadcast %111 : f32 to vector<2x256xf32>
    %113 = arith.mulf %112, %83 : vector<2x256xf32>
    %114 = arith.addf %110, %113 : vector<2x256xf32>
    %115 = arith.addf %50, %114 : vector<2x256xf32>
    %c29 = arith.constant 29 : index
    %116 = memref.load %arg1[%c29] : memref<98xf32, #tpu.memory_space<smem>>
    %117 = vector.broadcast %116 : f32 to vector<2x256xf32>
    %118 = arith.mulf %117, %78 : vector<2x256xf32>
    %c78 = arith.constant 78 : index
    %119 = memref.load %arg1[%c78] : memref<98xf32, #tpu.memory_space<smem>>
    %120 = vector.broadcast %119 : f32 to vector<2x256xf32>
    %121 = arith.mulf %120, %83 : vector<2x256xf32>
    %122 = arith.addf %118, %121 : vector<2x256xf32>
    %123 = arith.addf %57, %122 : vector<2x256xf32>
    %c36 = arith.constant 36 : index
    %124 = memref.load %arg1[%c36] : memref<98xf32, #tpu.memory_space<smem>>
    %125 = vector.broadcast %124 : f32 to vector<2x256xf32>
    %126 = arith.mulf %125, %78 : vector<2x256xf32>
    %c85 = arith.constant 85 : index
    %127 = memref.load %arg1[%c85] : memref<98xf32, #tpu.memory_space<smem>>
    %128 = vector.broadcast %127 : f32 to vector<2x256xf32>
    %129 = arith.mulf %128, %83 : vector<2x256xf32>
    %130 = arith.addf %126, %129 : vector<2x256xf32>
    %131 = arith.addf %64, %130 : vector<2x256xf32>
    %c43 = arith.constant 43 : index
    %132 = memref.load %arg1[%c43] : memref<98xf32, #tpu.memory_space<smem>>
    %133 = vector.broadcast %132 : f32 to vector<2x256xf32>
    %134 = arith.mulf %133, %78 : vector<2x256xf32>
    %c92 = arith.constant 92 : index
    %135 = memref.load %arg1[%c92] : memref<98xf32, #tpu.memory_space<smem>>
    %136 = vector.broadcast %135 : f32 to vector<2x256xf32>
    %137 = arith.mulf %136, %83 : vector<2x256xf32>
    %138 = arith.addf %134, %137 : vector<2x256xf32>
    %139 = arith.addf %71, %138 : vector<2x256xf32>
    %c1_i32 = arith.constant 1 : i32
    %140 = vector.broadcast %c1_i32 : i32 to vector<1x256xi32>
    %141 = arith.cmpi sge, %10, %140 : vector<1x256xi32>
    %c1_i32_19 = arith.constant 1 : i32
    %142 = tpu.dynamic_rotate %8 by %c1_i32_19 dim 1 : vector<2x256xf32>, i32 -> vector<2x256xf32>
    %cst_20 = arith.constant 0.000000e+00 : f32
    %143 = vector.shape_cast %141 : vector<1x256xi1> to vector<1x256xi1>
    %144 = vector.broadcast %143 : vector<1x256xi1> to vector<2x256xi1>
    %145 = vector.broadcast %cst_20 : f32 to vector<2x256xf32>
    %146 = arith.select %144, %142, %145 : vector<2x256xi1>, vector<2x256xf32>
    %c1_i32_21 = arith.constant 1 : i32
    %147 = tpu.dynamic_rotate %6 by %c1_i32_21 dim 1 : vector<2x256xf32>, i32 -> vector<2x256xf32>
    %cst_22 = arith.constant 0.000000e+00 : f32
    %148 = vector.shape_cast %141 : vector<1x256xi1> to vector<1x256xi1>
    %149 = vector.broadcast %148 : vector<1x256xi1> to vector<2x256xi1>
    %150 = vector.broadcast %cst_22 : f32 to vector<2x256xf32>
    %151 = arith.select %149, %147, %150 : vector<2x256xi1>, vector<2x256xf32>
    %c2 = arith.constant 2 : index
    %152 = memref.load %arg1[%c2] : memref<98xf32, #tpu.memory_space<smem>>
    %153 = vector.broadcast %152 : f32 to vector<2x256xf32>
    %154 = arith.mulf %153, %146 : vector<2x256xf32>
    %c51 = arith.constant 51 : index
    %155 = memref.load %arg1[%c51] : memref<98xf32, #tpu.memory_space<smem>>
    %156 = vector.broadcast %155 : f32 to vector<2x256xf32>
    %157 = arith.mulf %156, %151 : vector<2x256xf32>
    %158 = arith.addf %154, %157 : vector<2x256xf32>
    %159 = arith.addf %91, %158 : vector<2x256xf32>
    %c9 = arith.constant 9 : index
    %160 = memref.load %arg1[%c9] : memref<98xf32, #tpu.memory_space<smem>>
    %161 = vector.broadcast %160 : f32 to vector<2x256xf32>
    %162 = arith.mulf %161, %146 : vector<2x256xf32>
    %c58 = arith.constant 58 : index
    %163 = memref.load %arg1[%c58] : memref<98xf32, #tpu.memory_space<smem>>
    %164 = vector.broadcast %163 : f32 to vector<2x256xf32>
    %165 = arith.mulf %164, %151 : vector<2x256xf32>
    %166 = arith.addf %162, %165 : vector<2x256xf32>
    %167 = arith.addf %99, %166 : vector<2x256xf32>
    %c16 = arith.constant 16 : index
    %168 = memref.load %arg1[%c16] : memref<98xf32, #tpu.memory_space<smem>>
    %169 = vector.broadcast %168 : f32 to vector<2x256xf32>
    %170 = arith.mulf %169, %146 : vector<2x256xf32>
    %c65 = arith.constant 65 : index
    %171 = memref.load %arg1[%c65] : memref<98xf32, #tpu.memory_space<smem>>
    %172 = vector.broadcast %171 : f32 to vector<2x256xf32>
    %173 = arith.mulf %172, %151 : vector<2x256xf32>
    %174 = arith.addf %170, %173 : vector<2x256xf32>
    %175 = arith.addf %107, %174 : vector<2x256xf32>
    %c23 = arith.constant 23 : index
    %176 = memref.load %arg1[%c23] : memref<98xf32, #tpu.memory_space<smem>>
    %177 = vector.broadcast %176 : f32 to vector<2x256xf32>
    %178 = arith.mulf %177, %146 : vector<2x256xf32>
    %c72 = arith.constant 72 : index
    %179 = memref.load %arg1[%c72] : memref<98xf32, #tpu.memory_space<smem>>
    %180 = vector.broadcast %179 : f32 to vector<2x256xf32>
    %181 = arith.mulf %180, %151 : vector<2x256xf32>
    %182 = arith.addf %178, %181 : vector<2x256xf32>
    %183 = arith.addf %115, %182 : vector<2x256xf32>
    %c30 = arith.constant 30 : index
    %184 = memref.load %arg1[%c30] : memref<98xf32, #tpu.memory_space<smem>>
    %185 = vector.broadcast %184 : f32 to vector<2x256xf32>
    %186 = arith.mulf %185, %146 : vector<2x256xf32>
    %c79 = arith.constant 79 : index
    %187 = memref.load %arg1[%c79] : memref<98xf32, #tpu.memory_space<smem>>
    %188 = vector.broadcast %187 : f32 to vector<2x256xf32>
    %189 = arith.mulf %188, %151 : vector<2x256xf32>
    %190 = arith.addf %186, %189 : vector<2x256xf32>
    %191 = arith.addf %123, %190 : vector<2x256xf32>
    %c37 = arith.constant 37 : index
    %192 = memref.load %arg1[%c37] : memref<98xf32, #tpu.memory_space<smem>>
    %193 = vector.broadcast %192 : f32 to vector<2x256xf32>
    %194 = arith.mulf %193, %146 : vector<2x256xf32>
    %c86 = arith.constant 86 : index
    %195 = memref.load %arg1[%c86] : memref<98xf32, #tpu.memory_space<smem>>
    %196 = vector.broadcast %195 : f32 to vector<2x256xf32>
    %197 = arith.mulf %196, %151 : vector<2x256xf32>
    %198 = arith.addf %194, %197 : vector<2x256xf32>
    %199 = arith.addf %131, %198 : vector<2x256xf32>
    %c44 = arith.constant 44 : index
    %200 = memref.load %arg1[%c44] : memref<98xf32, #tpu.memory_space<smem>>
    %201 = vector.broadcast %200 : f32 to vector<2x256xf32>
    %202 = arith.mulf %201, %146 : vector<2x256xf32>
    %c93 = arith.constant 93 : index
    %203 = memref.load %arg1[%c93] : memref<98xf32, #tpu.memory_space<smem>>
    %204 = vector.broadcast %203 : f32 to vector<2x256xf32>
    %205 = arith.mulf %204, %151 : vector<2x256xf32>
    %206 = arith.addf %202, %205 : vector<2x256xf32>
    %207 = arith.addf %139, %206 : vector<2x256xf32>
    %c3 = arith.constant 3 : index
    %208 = memref.load %arg1[%c3] : memref<98xf32, #tpu.memory_space<smem>>
    %209 = vector.broadcast %208 : f32 to vector<2x256xf32>
    %210 = arith.mulf %209, %8 : vector<2x256xf32>
    %c52 = arith.constant 52 : index
    %211 = memref.load %arg1[%c52] : memref<98xf32, #tpu.memory_space<smem>>
    %212 = vector.broadcast %211 : f32 to vector<2x256xf32>
    %213 = arith.mulf %212, %6 : vector<2x256xf32>
    %214 = arith.addf %210, %213 : vector<2x256xf32>
    %215 = arith.addf %159, %214 : vector<2x256xf32>
    %c10 = arith.constant 10 : index
    %216 = memref.load %arg1[%c10] : memref<98xf32, #tpu.memory_space<smem>>
    %217 = vector.broadcast %216 : f32 to vector<2x256xf32>
    %218 = arith.mulf %217, %8 : vector<2x256xf32>
    %c59 = arith.constant 59 : index
    %219 = memref.load %arg1[%c59] : memref<98xf32, #tpu.memory_space<smem>>
    %220 = vector.broadcast %219 : f32 to vector<2x256xf32>
    %221 = arith.mulf %220, %6 : vector<2x256xf32>
    %222 = arith.addf %218, %221 : vector<2x256xf32>
    %223 = arith.addf %167, %222 : vector<2x256xf32>
    %c17 = arith.constant 17 : index
    %224 = memref.load %arg1[%c17] : memref<98xf32, #tpu.memory_space<smem>>
    %225 = vector.broadcast %224 : f32 to vector<2x256xf32>
    %226 = arith.mulf %225, %8 : vector<2x256xf32>
    %c66 = arith.constant 66 : index
    %227 = memref.load %arg1[%c66] : memref<98xf32, #tpu.memory_space<smem>>
    %228 = vector.broadcast %227 : f32 to vector<2x256xf32>
    %229 = arith.mulf %228, %6 : vector<2x256xf32>
    %230 = arith.addf %226, %229 : vector<2x256xf32>
    %231 = arith.addf %175, %230 : vector<2x256xf32>
    %c24 = arith.constant 24 : index
    %232 = memref.load %arg1[%c24] : memref<98xf32, #tpu.memory_space<smem>>
    %233 = vector.broadcast %232 : f32 to vector<2x256xf32>
    %234 = arith.mulf %233, %8 : vector<2x256xf32>
    %c73 = arith.constant 73 : index
    %235 = memref.load %arg1[%c73] : memref<98xf32, #tpu.memory_space<smem>>
    %236 = vector.broadcast %235 : f32 to vector<2x256xf32>
    %237 = arith.mulf %236, %6 : vector<2x256xf32>
    %238 = arith.addf %234, %237 : vector<2x256xf32>
    %239 = arith.addf %183, %238 : vector<2x256xf32>
    %c31 = arith.constant 31 : index
    %240 = memref.load %arg1[%c31] : memref<98xf32, #tpu.memory_space<smem>>
    %241 = vector.broadcast %240 : f32 to vector<2x256xf32>
    %242 = arith.mulf %241, %8 : vector<2x256xf32>
    %c80 = arith.constant 80 : index
    %243 = memref.load %arg1[%c80] : memref<98xf32, #tpu.memory_space<smem>>
    %244 = vector.broadcast %243 : f32 to vector<2x256xf32>
    %245 = arith.mulf %244, %6 : vector<2x256xf32>
    %246 = arith.addf %242, %245 : vector<2x256xf32>
    %247 = arith.addf %191, %246 : vector<2x256xf32>
    %c38 = arith.constant 38 : index
    %248 = memref.load %arg1[%c38] : memref<98xf32, #tpu.memory_space<smem>>
    %249 = vector.broadcast %248 : f32 to vector<2x256xf32>
    %250 = arith.mulf %249, %8 : vector<2x256xf32>
    %c87 = arith.constant 87 : index
    %251 = memref.load %arg1[%c87] : memref<98xf32, #tpu.memory_space<smem>>
    %252 = vector.broadcast %251 : f32 to vector<2x256xf32>
    %253 = arith.mulf %252, %6 : vector<2x256xf32>
    %254 = arith.addf %250, %253 : vector<2x256xf32>
    %255 = arith.addf %199, %254 : vector<2x256xf32>
    %c45 = arith.constant 45 : index
    %256 = memref.load %arg1[%c45] : memref<98xf32, #tpu.memory_space<smem>>
    %257 = vector.broadcast %256 : f32 to vector<2x256xf32>
    %258 = arith.mulf %257, %8 : vector<2x256xf32>
    %c94 = arith.constant 94 : index
    %259 = memref.load %arg1[%c94] : memref<98xf32, #tpu.memory_space<smem>>
    %260 = vector.broadcast %259 : f32 to vector<2x256xf32>
    %261 = arith.mulf %260, %6 : vector<2x256xf32>
    %262 = arith.addf %258, %261 : vector<2x256xf32>
    %263 = arith.addf %207, %262 : vector<2x256xf32>
    %c15_i32 = arith.constant 15 : i32
    %264 = vector.broadcast %c15_i32 : i32 to vector<1x256xi32>
    %265 = arith.cmpi slt, %10, %264 : vector<1x256xi32>
    %c255_i32 = arith.constant 255 : i32
    %266 = tpu.dynamic_rotate %8 by %c255_i32 dim 1 : vector<2x256xf32>, i32 -> vector<2x256xf32>
    %cst_23 = arith.constant 0.000000e+00 : f32
    %267 = vector.shape_cast %265 : vector<1x256xi1> to vector<1x256xi1>
    %268 = vector.broadcast %267 : vector<1x256xi1> to vector<2x256xi1>
    %269 = vector.broadcast %cst_23 : f32 to vector<2x256xf32>
    %270 = arith.select %268, %266, %269 : vector<2x256xi1>, vector<2x256xf32>
    %c255_i32_24 = arith.constant 255 : i32
    %271 = tpu.dynamic_rotate %6 by %c255_i32_24 dim 1 : vector<2x256xf32>, i32 -> vector<2x256xf32>
    %cst_25 = arith.constant 0.000000e+00 : f32
    %272 = vector.shape_cast %265 : vector<1x256xi1> to vector<1x256xi1>
    %273 = vector.broadcast %272 : vector<1x256xi1> to vector<2x256xi1>
    %274 = vector.broadcast %cst_25 : f32 to vector<2x256xf32>
    %275 = arith.select %273, %271, %274 : vector<2x256xi1>, vector<2x256xf32>
    %c4 = arith.constant 4 : index
    %276 = memref.load %arg1[%c4] : memref<98xf32, #tpu.memory_space<smem>>
    %277 = vector.broadcast %276 : f32 to vector<2x256xf32>
    %278 = arith.mulf %277, %270 : vector<2x256xf32>
    %c53 = arith.constant 53 : index
    %279 = memref.load %arg1[%c53] : memref<98xf32, #tpu.memory_space<smem>>
    %280 = vector.broadcast %279 : f32 to vector<2x256xf32>
    %281 = arith.mulf %280, %275 : vector<2x256xf32>
    %282 = arith.addf %278, %281 : vector<2x256xf32>
    %283 = arith.addf %215, %282 : vector<2x256xf32>
    %c11 = arith.constant 11 : index
    %284 = memref.load %arg1[%c11] : memref<98xf32, #tpu.memory_space<smem>>
    %285 = vector.broadcast %284 : f32 to vector<2x256xf32>
    %286 = arith.mulf %285, %270 : vector<2x256xf32>
    %c60 = arith.constant 60 : index
    %287 = memref.load %arg1[%c60] : memref<98xf32, #tpu.memory_space<smem>>
    %288 = vector.broadcast %287 : f32 to vector<2x256xf32>
    %289 = arith.mulf %288, %275 : vector<2x256xf32>
    %290 = arith.addf %286, %289 : vector<2x256xf32>
    %291 = arith.addf %223, %290 : vector<2x256xf32>
    %c18 = arith.constant 18 : index
    %292 = memref.load %arg1[%c18] : memref<98xf32, #tpu.memory_space<smem>>
    %293 = vector.broadcast %292 : f32 to vector<2x256xf32>
    %294 = arith.mulf %293, %270 : vector<2x256xf32>
    %c67 = arith.constant 67 : index
    %295 = memref.load %arg1[%c67] : memref<98xf32, #tpu.memory_space<smem>>
    %296 = vector.broadcast %295 : f32 to vector<2x256xf32>
    %297 = arith.mulf %296, %275 : vector<2x256xf32>
    %298 = arith.addf %294, %297 : vector<2x256xf32>
    %299 = arith.addf %231, %298 : vector<2x256xf32>
    %c25 = arith.constant 25 : index
    %300 = memref.load %arg1[%c25] : memref<98xf32, #tpu.memory_space<smem>>
    %301 = vector.broadcast %300 : f32 to vector<2x256xf32>
    %302 = arith.mulf %301, %270 : vector<2x256xf32>
    %c74 = arith.constant 74 : index
    %303 = memref.load %arg1[%c74] : memref<98xf32, #tpu.memory_space<smem>>
    %304 = vector.broadcast %303 : f32 to vector<2x256xf32>
    %305 = arith.mulf %304, %275 : vector<2x256xf32>
    %306 = arith.addf %302, %305 : vector<2x256xf32>
    %307 = arith.addf %239, %306 : vector<2x256xf32>
    %c32 = arith.constant 32 : index
    %308 = memref.load %arg1[%c32] : memref<98xf32, #tpu.memory_space<smem>>
    %309 = vector.broadcast %308 : f32 to vector<2x256xf32>
    %310 = arith.mulf %309, %270 : vector<2x256xf32>
    %c81 = arith.constant 81 : index
    %311 = memref.load %arg1[%c81] : memref<98xf32, #tpu.memory_space<smem>>
    %312 = vector.broadcast %311 : f32 to vector<2x256xf32>
    %313 = arith.mulf %312, %275 : vector<2x256xf32>
    %314 = arith.addf %310, %313 : vector<2x256xf32>
    %315 = arith.addf %247, %314 : vector<2x256xf32>
    %c39 = arith.constant 39 : index
    %316 = memref.load %arg1[%c39] : memref<98xf32, #tpu.memory_space<smem>>
    %317 = vector.broadcast %316 : f32 to vector<2x256xf32>
    %318 = arith.mulf %317, %270 : vector<2x256xf32>
    %c88 = arith.constant 88 : index
    %319 = memref.load %arg1[%c88] : memref<98xf32, #tpu.memory_space<smem>>
    %320 = vector.broadcast %319 : f32 to vector<2x256xf32>
    %321 = arith.mulf %320, %275 : vector<2x256xf32>
    %322 = arith.addf %318, %321 : vector<2x256xf32>
    %323 = arith.addf %255, %322 : vector<2x256xf32>
    %c46 = arith.constant 46 : index
    %324 = memref.load %arg1[%c46] : memref<98xf32, #tpu.memory_space<smem>>
    %325 = vector.broadcast %324 : f32 to vector<2x256xf32>
    %326 = arith.mulf %325, %270 : vector<2x256xf32>
    %c95 = arith.constant 95 : index
    %327 = memref.load %arg1[%c95] : memref<98xf32, #tpu.memory_space<smem>>
    %328 = vector.broadcast %327 : f32 to vector<2x256xf32>
    %329 = arith.mulf %328, %275 : vector<2x256xf32>
    %330 = arith.addf %326, %329 : vector<2x256xf32>
    %331 = arith.addf %263, %330 : vector<2x256xf32>
    %c14_i32 = arith.constant 14 : i32
    %332 = vector.broadcast %c14_i32 : i32 to vector<1x256xi32>
    %333 = arith.cmpi slt, %10, %332 : vector<1x256xi32>
    %c254_i32 = arith.constant 254 : i32
    %334 = tpu.dynamic_rotate %8 by %c254_i32 dim 1 : vector<2x256xf32>, i32 -> vector<2x256xf32>
    %cst_26 = arith.constant 0.000000e+00 : f32
    %335 = vector.shape_cast %333 : vector<1x256xi1> to vector<1x256xi1>
    %336 = vector.broadcast %335 : vector<1x256xi1> to vector<2x256xi1>
    %337 = vector.broadcast %cst_26 : f32 to vector<2x256xf32>
    %338 = arith.select %336, %334, %337 : vector<2x256xi1>, vector<2x256xf32>
    %c254_i32_27 = arith.constant 254 : i32
    %339 = tpu.dynamic_rotate %6 by %c254_i32_27 dim 1 : vector<2x256xf32>, i32 -> vector<2x256xf32>
    %cst_28 = arith.constant 0.000000e+00 : f32
    %340 = vector.shape_cast %333 : vector<1x256xi1> to vector<1x256xi1>
    %341 = vector.broadcast %340 : vector<1x256xi1> to vector<2x256xi1>
    %342 = vector.broadcast %cst_28 : f32 to vector<2x256xf32>
    %343 = arith.select %341, %339, %342 : vector<2x256xi1>, vector<2x256xf32>
    %c5 = arith.constant 5 : index
    %344 = memref.load %arg1[%c5] : memref<98xf32, #tpu.memory_space<smem>>
    %345 = vector.broadcast %344 : f32 to vector<2x256xf32>
    %346 = arith.mulf %345, %338 : vector<2x256xf32>
    %c54 = arith.constant 54 : index
    %347 = memref.load %arg1[%c54] : memref<98xf32, #tpu.memory_space<smem>>
    %348 = vector.broadcast %347 : f32 to vector<2x256xf32>
    %349 = arith.mulf %348, %343 : vector<2x256xf32>
    %350 = arith.addf %346, %349 : vector<2x256xf32>
    %351 = arith.addf %283, %350 : vector<2x256xf32>
    %c12 = arith.constant 12 : index
    %352 = memref.load %arg1[%c12] : memref<98xf32, #tpu.memory_space<smem>>
    %353 = vector.broadcast %352 : f32 to vector<2x256xf32>
    %354 = arith.mulf %353, %338 : vector<2x256xf32>
    %c61 = arith.constant 61 : index
    %355 = memref.load %arg1[%c61] : memref<98xf32, #tpu.memory_space<smem>>
    %356 = vector.broadcast %355 : f32 to vector<2x256xf32>
    %357 = arith.mulf %356, %343 : vector<2x256xf32>
    %358 = arith.addf %354, %357 : vector<2x256xf32>
    %359 = arith.addf %291, %358 : vector<2x256xf32>
    %c19 = arith.constant 19 : index
    %360 = memref.load %arg1[%c19] : memref<98xf32, #tpu.memory_space<smem>>
    %361 = vector.broadcast %360 : f32 to vector<2x256xf32>
    %362 = arith.mulf %361, %338 : vector<2x256xf32>
    %c68 = arith.constant 68 : index
    %363 = memref.load %arg1[%c68] : memref<98xf32, #tpu.memory_space<smem>>
    %364 = vector.broadcast %363 : f32 to vector<2x256xf32>
    %365 = arith.mulf %364, %343 : vector<2x256xf32>
    %366 = arith.addf %362, %365 : vector<2x256xf32>
    %367 = arith.addf %299, %366 : vector<2x256xf32>
    %c26 = arith.constant 26 : index
    %368 = memref.load %arg1[%c26] : memref<98xf32, #tpu.memory_space<smem>>
    %369 = vector.broadcast %368 : f32 to vector<2x256xf32>
    %370 = arith.mulf %369, %338 : vector<2x256xf32>
    %c75 = arith.constant 75 : index
    %371 = memref.load %arg1[%c75] : memref<98xf32, #tpu.memory_space<smem>>
    %372 = vector.broadcast %371 : f32 to vector<2x256xf32>
    %373 = arith.mulf %372, %343 : vector<2x256xf32>
    %374 = arith.addf %370, %373 : vector<2x256xf32>
    %375 = arith.addf %307, %374 : vector<2x256xf32>
    %c33 = arith.constant 33 : index
    %376 = memref.load %arg1[%c33] : memref<98xf32, #tpu.memory_space<smem>>
    %377 = vector.broadcast %376 : f32 to vector<2x256xf32>
    %378 = arith.mulf %377, %338 : vector<2x256xf32>
    %c82 = arith.constant 82 : index
    %379 = memref.load %arg1[%c82] : memref<98xf32, #tpu.memory_space<smem>>
    %380 = vector.broadcast %379 : f32 to vector<2x256xf32>
    %381 = arith.mulf %380, %343 : vector<2x256xf32>
    %382 = arith.addf %378, %381 : vector<2x256xf32>
    %383 = arith.addf %315, %382 : vector<2x256xf32>
    %c40 = arith.constant 40 : index
    %384 = memref.load %arg1[%c40] : memref<98xf32, #tpu.memory_space<smem>>
    %385 = vector.broadcast %384 : f32 to vector<2x256xf32>
    %386 = arith.mulf %385, %338 : vector<2x256xf32>
    %c89 = arith.constant 89 : index
    %387 = memref.load %arg1[%c89] : memref<98xf32, #tpu.memory_space<smem>>
    %388 = vector.broadcast %387 : f32 to vector<2x256xf32>
    %389 = arith.mulf %388, %343 : vector<2x256xf32>
    %390 = arith.addf %386, %389 : vector<2x256xf32>
    %391 = arith.addf %323, %390 : vector<2x256xf32>
    %c47 = arith.constant 47 : index
    %392 = memref.load %arg1[%c47] : memref<98xf32, #tpu.memory_space<smem>>
    %393 = vector.broadcast %392 : f32 to vector<2x256xf32>
    %394 = arith.mulf %393, %338 : vector<2x256xf32>
    %c96 = arith.constant 96 : index
    %395 = memref.load %arg1[%c96] : memref<98xf32, #tpu.memory_space<smem>>
    %396 = vector.broadcast %395 : f32 to vector<2x256xf32>
    %397 = arith.mulf %396, %343 : vector<2x256xf32>
    %398 = arith.addf %394, %397 : vector<2x256xf32>
    %399 = arith.addf %331, %398 : vector<2x256xf32>
    %c13_i32 = arith.constant 13 : i32
    %400 = vector.broadcast %c13_i32 : i32 to vector<1x256xi32>
    %401 = arith.cmpi slt, %10, %400 : vector<1x256xi32>
    %c253_i32 = arith.constant 253 : i32
    %402 = tpu.dynamic_rotate %8 by %c253_i32 dim 1 : vector<2x256xf32>, i32 -> vector<2x256xf32>
    %cst_29 = arith.constant 0.000000e+00 : f32
    %403 = vector.shape_cast %401 : vector<1x256xi1> to vector<1x256xi1>
    %404 = vector.broadcast %403 : vector<1x256xi1> to vector<2x256xi1>
    %405 = vector.broadcast %cst_29 : f32 to vector<2x256xf32>
    %406 = arith.select %404, %402, %405 : vector<2x256xi1>, vector<2x256xf32>
    %c253_i32_30 = arith.constant 253 : i32
    %407 = tpu.dynamic_rotate %6 by %c253_i32_30 dim 1 : vector<2x256xf32>, i32 -> vector<2x256xf32>
    %cst_31 = arith.constant 0.000000e+00 : f32
    %408 = vector.shape_cast %401 : vector<1x256xi1> to vector<1x256xi1>
    %409 = vector.broadcast %408 : vector<1x256xi1> to vector<2x256xi1>
    %410 = vector.broadcast %cst_31 : f32 to vector<2x256xf32>
    %411 = arith.select %409, %407, %410 : vector<2x256xi1>, vector<2x256xf32>
    %c6 = arith.constant 6 : index
    %412 = memref.load %arg1[%c6] : memref<98xf32, #tpu.memory_space<smem>>
    %413 = vector.broadcast %412 : f32 to vector<2x256xf32>
    %414 = arith.mulf %413, %406 : vector<2x256xf32>
    %c55 = arith.constant 55 : index
    %415 = memref.load %arg1[%c55] : memref<98xf32, #tpu.memory_space<smem>>
    %416 = vector.broadcast %415 : f32 to vector<2x256xf32>
    %417 = arith.mulf %416, %411 : vector<2x256xf32>
    %418 = arith.addf %414, %417 : vector<2x256xf32>
    %419 = arith.addf %351, %418 : vector<2x256xf32>
    %c13 = arith.constant 13 : index
    %420 = memref.load %arg1[%c13] : memref<98xf32, #tpu.memory_space<smem>>
    %421 = vector.broadcast %420 : f32 to vector<2x256xf32>
    %422 = arith.mulf %421, %406 : vector<2x256xf32>
    %c62 = arith.constant 62 : index
    %423 = memref.load %arg1[%c62] : memref<98xf32, #tpu.memory_space<smem>>
    %424 = vector.broadcast %423 : f32 to vector<2x256xf32>
    %425 = arith.mulf %424, %411 : vector<2x256xf32>
    %426 = arith.addf %422, %425 : vector<2x256xf32>
    %427 = arith.addf %359, %426 : vector<2x256xf32>
    %c20 = arith.constant 20 : index
    %428 = memref.load %arg1[%c20] : memref<98xf32, #tpu.memory_space<smem>>
    %429 = vector.broadcast %428 : f32 to vector<2x256xf32>
    %430 = arith.mulf %429, %406 : vector<2x256xf32>
    %c69 = arith.constant 69 : index
    %431 = memref.load %arg1[%c69] : memref<98xf32, #tpu.memory_space<smem>>
    %432 = vector.broadcast %431 : f32 to vector<2x256xf32>
    %433 = arith.mulf %432, %411 : vector<2x256xf32>
    %434 = arith.addf %430, %433 : vector<2x256xf32>
    %435 = arith.addf %367, %434 : vector<2x256xf32>
    %c27 = arith.constant 27 : index
    %436 = memref.load %arg1[%c27] : memref<98xf32, #tpu.memory_space<smem>>
    %437 = vector.broadcast %436 : f32 to vector<2x256xf32>
    %438 = arith.mulf %437, %406 : vector<2x256xf32>
    %c76 = arith.constant 76 : index
    %439 = memref.load %arg1[%c76] : memref<98xf32, #tpu.memory_space<smem>>
    %440 = vector.broadcast %439 : f32 to vector<2x256xf32>
    %441 = arith.mulf %440, %411 : vector<2x256xf32>
    %442 = arith.addf %438, %441 : vector<2x256xf32>
    %443 = arith.addf %375, %442 : vector<2x256xf32>
    %c34 = arith.constant 34 : index
    %444 = memref.load %arg1[%c34] : memref<98xf32, #tpu.memory_space<smem>>
    %445 = vector.broadcast %444 : f32 to vector<2x256xf32>
    %446 = arith.mulf %445, %406 : vector<2x256xf32>
    %c83 = arith.constant 83 : index
    %447 = memref.load %arg1[%c83] : memref<98xf32, #tpu.memory_space<smem>>
    %448 = vector.broadcast %447 : f32 to vector<2x256xf32>
    %449 = arith.mulf %448, %411 : vector<2x256xf32>
    %450 = arith.addf %446, %449 : vector<2x256xf32>
    %451 = arith.addf %383, %450 : vector<2x256xf32>
    %c41 = arith.constant 41 : index
    %452 = memref.load %arg1[%c41] : memref<98xf32, #tpu.memory_space<smem>>
    %453 = vector.broadcast %452 : f32 to vector<2x256xf32>
    %454 = arith.mulf %453, %406 : vector<2x256xf32>
    %c90 = arith.constant 90 : index
    %455 = memref.load %arg1[%c90] : memref<98xf32, #tpu.memory_space<smem>>
    %456 = vector.broadcast %455 : f32 to vector<2x256xf32>
    %457 = arith.mulf %456, %411 : vector<2x256xf32>
    %458 = arith.addf %454, %457 : vector<2x256xf32>
    %459 = arith.addf %391, %458 : vector<2x256xf32>
    %c48 = arith.constant 48 : index
    %460 = memref.load %arg1[%c48] : memref<98xf32, #tpu.memory_space<smem>>
    %461 = vector.broadcast %460 : f32 to vector<2x256xf32>
    %462 = arith.mulf %461, %406 : vector<2x256xf32>
    %c97 = arith.constant 97 : index
    %463 = memref.load %arg1[%c97] : memref<98xf32, #tpu.memory_space<smem>>
    %464 = vector.broadcast %463 : f32 to vector<2x256xf32>
    %465 = arith.mulf %464, %411 : vector<2x256xf32>
    %466 = arith.addf %462, %465 : vector<2x256xf32>
    %467 = arith.addf %399, %466 : vector<2x256xf32>
    %c48_i32 = arith.constant 48 : i32
    %468 = tpu.dynamic_rotate %419 by %c48_i32 dim 1 : vector<2x256xf32>, i32 -> vector<2x256xf32>
    %c3_i32_32 = arith.constant 3 : i32
    %469 = vector.broadcast %c3_i32_32 : i32 to vector<1x256xi32>
    %470 = arith.cmpi sge, %9, %469 : vector<1x256xi32>
    %cst_33 = arith.constant 0.000000e+00 : f32
    %471 = vector.shape_cast %470 : vector<1x256xi1> to vector<1x256xi1>
    %472 = vector.broadcast %471 : vector<1x256xi1> to vector<2x256xi1>
    %473 = vector.broadcast %cst_33 : f32 to vector<2x256xf32>
    %474 = arith.select %472, %468, %473 : vector<2x256xi1>, vector<2x256xf32>
    %c32_i32 = arith.constant 32 : i32
    %475 = tpu.dynamic_rotate %427 by %c32_i32 dim 1 : vector<2x256xf32>, i32 -> vector<2x256xf32>
    %c2_i32_34 = arith.constant 2 : i32
    %476 = vector.broadcast %c2_i32_34 : i32 to vector<1x256xi32>
    %477 = arith.cmpi sge, %9, %476 : vector<1x256xi32>
    %cst_35 = arith.constant 0.000000e+00 : f32
    %478 = vector.shape_cast %477 : vector<1x256xi1> to vector<1x256xi1>
    %479 = vector.broadcast %478 : vector<1x256xi1> to vector<2x256xi1>
    %480 = vector.broadcast %cst_35 : f32 to vector<2x256xf32>
    %481 = arith.select %479, %475, %480 : vector<2x256xi1>, vector<2x256xf32>
    %482 = arith.addf %474, %481 : vector<2x256xf32>
    %c16_i32 = arith.constant 16 : i32
    %483 = tpu.dynamic_rotate %435 by %c16_i32 dim 1 : vector<2x256xf32>, i32 -> vector<2x256xf32>
    %c1_i32_36 = arith.constant 1 : i32
    %484 = vector.broadcast %c1_i32_36 : i32 to vector<1x256xi32>
    %485 = arith.cmpi sge, %9, %484 : vector<1x256xi32>
    %cst_37 = arith.constant 0.000000e+00 : f32
    %486 = vector.shape_cast %485 : vector<1x256xi1> to vector<1x256xi1>
    %487 = vector.broadcast %486 : vector<1x256xi1> to vector<2x256xi1>
    %488 = vector.broadcast %cst_37 : f32 to vector<2x256xf32>
    %489 = arith.select %487, %483, %488 : vector<2x256xi1>, vector<2x256xf32>
    %490 = arith.addf %482, %489 : vector<2x256xf32>
    %491 = arith.addf %490, %443 : vector<2x256xf32>
    %c240_i32 = arith.constant 240 : i32
    %492 = tpu.dynamic_rotate %451 by %c240_i32 dim 1 : vector<2x256xf32>, i32 -> vector<2x256xf32>
    %c15_i32_38 = arith.constant 15 : i32
    %493 = vector.broadcast %c15_i32_38 : i32 to vector<1x256xi32>
    %494 = arith.cmpi slt, %9, %493 : vector<1x256xi32>
    %cst_39 = arith.constant 0.000000e+00 : f32
    %495 = vector.shape_cast %494 : vector<1x256xi1> to vector<1x256xi1>
    %496 = vector.broadcast %495 : vector<1x256xi1> to vector<2x256xi1>
    %497 = vector.broadcast %cst_39 : f32 to vector<2x256xf32>
    %498 = arith.select %496, %492, %497 : vector<2x256xi1>, vector<2x256xf32>
    %499 = arith.addf %491, %498 : vector<2x256xf32>
    %c224_i32 = arith.constant 224 : i32
    %500 = tpu.dynamic_rotate %459 by %c224_i32 dim 1 : vector<2x256xf32>, i32 -> vector<2x256xf32>
    %c14_i32_40 = arith.constant 14 : i32
    %501 = vector.broadcast %c14_i32_40 : i32 to vector<1x256xi32>
    %502 = arith.cmpi slt, %9, %501 : vector<1x256xi32>
    %cst_41 = arith.constant 0.000000e+00 : f32
    %503 = vector.shape_cast %502 : vector<1x256xi1> to vector<1x256xi1>
    %504 = vector.broadcast %503 : vector<1x256xi1> to vector<2x256xi1>
    %505 = vector.broadcast %cst_41 : f32 to vector<2x256xf32>
    %506 = arith.select %504, %500, %505 : vector<2x256xi1>, vector<2x256xf32>
    %507 = arith.addf %499, %506 : vector<2x256xf32>
    %c208_i32 = arith.constant 208 : i32
    %508 = tpu.dynamic_rotate %467 by %c208_i32 dim 1 : vector<2x256xf32>, i32 -> vector<2x256xf32>
    %c13_i32_42 = arith.constant 13 : i32
    %509 = vector.broadcast %c13_i32_42 : i32 to vector<1x256xi32>
    %510 = arith.cmpi slt, %9, %509 : vector<1x256xi32>
    %cst_43 = arith.constant 0.000000e+00 : f32
    %511 = vector.shape_cast %510 : vector<1x256xi1> to vector<1x256xi1>
    %512 = vector.broadcast %511 : vector<1x256xi1> to vector<2x256xi1>
    %513 = vector.broadcast %cst_43 : f32 to vector<2x256xf32>
    %514 = arith.select %512, %508, %513 : vector<2x256xi1>, vector<2x256xf32>
    %515 = arith.addf %507, %514 : vector<2x256xf32>
    %516 = arith.negf %515 : vector<2x256xf32>
    %517 = math.exp %516 : vector<2x256xf32>
    %cst_44 = arith.constant 1.000000e+00 : f32
    %518 = vector.broadcast %cst_44 : f32 to vector<2x256xf32>
    %519 = arith.addf %518, %517 : vector<2x256xf32>
    %520 = arith.divf %518, %519 : vector<2x256xf32>
    %521 = vector.shape_cast %520 : vector<2x256xf32> to vector<2x1x256xf32>
    %c0_45 = arith.constant 0 : index
    %c0_46 = arith.constant 0 : index
    %c0_47 = arith.constant 0 : index
    %522 = vector.load %arg3[%c0_45, %c0_46, %c0_47] : memref<2x4x256xf32, #tpu.memory_space<vmem>>, vector<2x4x256xf32>
    %523 = vector.broadcast %521 : vector<2x1x256xf32> to vector<2x4x256xf32>
    %524 = arith.mulf %522, %523 : vector<2x4x256xf32>
    %c0_48 = arith.constant 0 : index
    %c0_49 = arith.constant 0 : index
    %c0_50 = arith.constant 0 : index
    %525 = vector.load %arg4[%c0_48, %c0_49, %c0_50] : memref<2x4x256xf32, #tpu.memory_space<vmem>>, vector<2x4x256xf32>
    tpu.vector_store %arg4[%c0_48, %c0_49, %c0_50], %524 {strides = array<i32>} : memref<2x4x256xf32, #tpu.memory_space<vmem>>, vector<2x4x256xf32>,
    return
  }
  func.func @transform_0(%arg0: i32) -> i32 {
    %c0_i32 = arith.constant 0 : i32
    %c0_i32_0 = arith.constant 0 : i32
    return %c0_i32 : i32
  }
  func.func @transform_1(%arg0: i32) -> (i32, i32) {
    %c0_i32 = arith.constant 0 : i32
    %c0_i32_0 = arith.constant 0 : i32
    %c0_i32_1 = arith.constant 0 : i32
    return %c0_i32, %c0_i32_0 : i32, i32
  }
  func.func @transform_2(%arg0: i32) -> (i32, i32, i32) {
    %c0_i32 = arith.constant 0 : i32
    %c0_i32_0 = arith.constant 0 : i32
    %c0_i32_1 = arith.constant 0 : i32
    return %arg0, %c0_i32, %c0_i32_0 : i32, i32, i32
  }
  func.func @transform_3(%arg0: i32) -> (i32, i32, i32) {
    %c0_i32 = arith.constant 0 : i32
    %c0_i32_0 = arith.constant 0 : i32
    %c0_i32_1 = arith.constant 0 : i32
    return %arg0, %c0_i32, %c0_i32_0 : i32, i32, i32
  }
}

</mosaic_0001>

<bundles_post_ra>
// kernel: tpu_custom_call.1
= control target key start
LH: loop header
LB: loop body
LE: loop exit
PB: predicated region body
PF: predicated region fallthrough
CT: control target
= control target key end

     0   :  { %s2997_s0 = inlined_call_operand.hbm [shape: f32[98], index: 0, kind: input, shape index: {}]   ;;  %s2998_s1 = inlined_call_operand.hbm [shape: s32[2,256], index: 1, kind: input, shape index: {}]   ;;  %s2999_s2 = inlined_call_operand.hbm [shape: f32[2,4,256], index: 2, kind: input, shape index: {}]   ;;  %s3000_s3 = inlined_call_operand.hbm [shape: f32[2,4,256], index: 3, kind: output, shape index: {}]  }
   0x1   :  { %3116 = sst [smem:[#allocation127_spill]] %s3000_s3 }
   0x2   :  { %8 = vsyncpa [#allocation5], 0 }
   0x3   :  { %9 = vsyncpa [#allocation3], 0 }
   0x4   :  { %10 = vsyncpa [#allocation8], 0 }
   0x5   :  { %11 = vsyncpa [#allocation4], 0  ;;  %s1342_s14 = scalar_lea.hbm %s2997_s0, 16 }
   0x6   :  { %p1343_p0 = scmp.ne.s32.totalorder %s2997_s0, %s1342_s14  ;;  %p1346_p1 = scmp.lt.u32.totalorder %s1342_s14, %s2997_s0 }
   0x8   :  { %p1348_p2 = pnand %p1346_p1, %p1343_p0 }
   0xa   :  { %1351 = shalt.err (!%p1348_p2)
}
   0xb   :  { %s1426_s19 = smov [#allocation2]   ;;  %s1427_s22 = smov [#allocation6]  }
   0xc   :  { %19 = dma.hbm_to_smem %s2997_s0, 16, %s1426_s19, [#allocation5]  }
   0xd   :  { %s26_s23 = sshll.u32 %s1427_s22, 4  ;;  %s1428_s24 = smov [#allocation7]   ;;  %s27_s23 = int_to_ptr.vmem [resolvable:$true] %s26_s23 }
   0xe   :  { %s35_s25 = sshll.u32 %s1428_s24, 4  ;;  %s1352_s28 = scalar_lea.hbm %s2998_s1, 64  ;;  %s36_s25 = int_to_ptr.vmem [resolvable:$true] %s35_s25 }
   0xf   :  { %p1353_p3 = scmp.ne.s32.totalorder %s2998_s1, %s1352_s28  ;;  %p1356_p4 = scmp.lt.u32.totalorder %s1352_s28, %s2998_s1 }
  0x11   :  { %p1358_p5 = pnand %p1356_p4, %p1353_p3 }
  0x13   :  { %1361 = shalt.err (!%p1358_p5)
}
  0x14   :  { %s1362_s0 = scalar_lea.vmem %s27_s23, 64  ;;  %p1367_p7 = scmp.lt.s32.totalorder %s27_s23, %s27_s23 }
  0x15   :  { %p1363_p6 = scmp.ne.s32.totalorder %s27_s23, %s1362_s0  ;;  %p1368_p8 = scmp.lt.s32.totalorder %s1362_s0, %s1362_s0 }
  0x17   :  { %p1369_p9 = por %p1368_p8, %p1367_p7 }
  0x19   :  { %p1370_p10 = pnand %p1369_p9, %p1363_p6 }
  0x1b   :  { %1373 = shalt.err (!%p1370_p10)
}
  0x1c   :  { %29 = dma.hbm_to_vmem [thread:$0]  %s2998_s1, 64, %s27_s23, [#allocation3]  }
  0x1d   :  { %s1374_s10 = scalar_lea.hbm %s2999_s2, 256 }
  0x1e   :  { %p1375_p11 = scmp.ne.s32.totalorder %s2999_s2, %s1374_s10  ;;  %p1378_p12 = scmp.lt.u32.totalorder %s1374_s10, %s2999_s2 }
  0x20   :  { %p1380_p13 = pnand %p1378_p12, %p1375_p11 }
  0x22   :  { %1383 = shalt.err (!%p1380_p13)
}
  0x23   :  { %s1384_s15 = scalar_lea.vmem %s36_s25, 256  ;;  %p1389_p1 = scmp.lt.s32.totalorder %s36_s25, %s36_s25 }
  0x24   :  { %p1385_p0 = scmp.ne.s32.totalorder %s36_s25, %s1384_s15  ;;  %p1390_p2 = scmp.lt.s32.totalorder %s1384_s15, %s1384_s15 }
  0x26   :  { %p1391_p3 = por %p1390_p2, %p1389_p1 }
  0x28   :  { %p1392_p4 = pnand %p1391_p3, %p1385_p0 }
  0x2a   :  { %1395 = shalt.err (!%p1392_p4)
}
  0x2b   :  { %s3001_s1 = smov 128   ;;  %s3002_s16 = smov 8  }
  0x2c   :  { %41 = dma.hbm_to_vmem [thread:$0]  %s2999_s2, 256, %s36_s25, [#allocation8], %s3001_s1, %s3001_s1, %s3002_s16  }
  0x2d   :  { %1418 = dma.done.wait [#allocation5], 16  }
  0x2e   :  { %1419 = vsyncadd [#allocation5], 4294967280 }
  0x2f   :  { %1420 = dma.done.wait [#allocation3], 64  }
  0x30   :  { %1421 = vsyncadd [#allocation3], 4294967232 }
  0x31   :  { %1422 = dma.done.wait [#allocation8], 256  }
  0x32   :  { %1423 = vsyncadd [#allocation8], 4294967040 }
  0x33   :  { %51 = sfence }
  0x34   :  { %v52_v0 = vld [vmem:[#allocation7] sm:$0xff]  ;;  %v53_v1 = vld [vmem:[#allocation7 + $0x8] sm:$0xff]  ;;  %vm60_vm0 = vcmask 1043456   ;;  %vm133_vm1 = vcmask 1041409   ;;  %s1431_s2 = smov 2   ;;  %s1432_s19 = smov 3  }
  0x35   :  { %v93_v2 = vsel %vm60_vm0, %v52_v0, -inf  ;;  %v107_v3 = vsel %vm60_vm0, %v53_v1, -inf  ;;  %v61_v4 = vsel %vm60_vm0, %v52_v0, 0.0  ;;  %v75_v5 = vsel %vm60_vm0, %v53_v1, 0.0  ;;  %s1433_s20 = smov 1   ;;  %s1434_s21 = smov 127  }
  0x36   :  { %v94_v6 = vrot.slane %v93_v2, 4  ;;  %v108_v7 = vrot.slane %v107_v3, 4  ;;  %v62_v8 = vrot.slane %v61_v4, 4  ;;  %v76_v9 = vrot.slane %v75_v5, 4  ;;  %s1435_s22 = smov 126   ;;  %s1436_s23 = smov 125  }
  0x37   :  { %v56_v10 = vcombine.high %v52_v0, %v52_v0  ;;  %v57_v11 = vcombine.high %v53_v1, %v53_v1  ;;  %s1541_s24 = sld [smem:[#allocation2 + $0x31]]  ;;  %s1543_s25 = sld [smem:[#allocation2 + $0x38]] }
  0x38   :  { %v95_v12 = vmax.f32 %v93_v2, %v94_v6  ;;  %v109_v13 = vmax.f32 %v107_v3, %v108_v7  ;;  %v63_v14 = vadd.f32 %v62_v8, %v61_v4  ;;  %v77_v15 = vadd.f32 %v76_v9, %v75_v5  ;;  %s1545_s26 = sld [smem:[#allocation2 + $0x3f]]  ;;  %s1547_s27 = sld [smem:[#allocation2 + $0x46]]  ;;  %v1559_v5 = vld [vmem:[#allocation6 + $0x1] ss:$2 sm:$0x3] }
  0x39   :  { %v100_v16 = vsel %vm60_vm0, %v56_v10, -inf  ;;  %v114_v17 = vsel %vm60_vm0, %v57_v11, -inf  ;;  %v68_v18 = vsel %vm60_vm0, %v56_v10, 0.0  ;;  %v82_v19 = vsel %vm60_vm0, %v57_v11, 0.0  ;;  %s1549_s28 = sld [smem:[#allocation2 + $0x4d]]  ;;  %s1551_s29 = sld [smem:[#allocation2 + $0x54]] }
  0x3a   :  { %v96_v20 = vrot.slane %v95_v12, 2  ;;  %v110_v21 = vrot.slane %v109_v13, 2  ;;  %v64_v22 = vrot.slane %v63_v14, 2  ;;  %v78_v23 = vrot.slane %v77_v15, 2  ;;  %s1553_s30 = sld [smem:[#allocation2 + $0x5b]]  ;;  %s1555_s4 = sld [smem:[#allocation2 + $0x32]] }
  0x3b   :  { %v101_v24 = vrot.slane %v100_v16, 4  ;;  %v115_v25 = vrot.slane %v114_v17, 4  ;;  %v69_v26 = vrot.slane %v68_v18, 4  ;;  %v83_v27 = vrot.slane %v82_v19, 4  ;;  %s1557_s5 = sld [smem:[#allocation2 + $0x39]]  ;;  %s1561_s0 = sld [smem:[#allocation2 + $0x40]] }
  0x3c   :  { %v97_v28 = vmax.f32 %v95_v12, %v96_v20  ;;  %v111_v29 = vmax.f32 %v109_v13, %v110_v21  ;;  %v65_v30 = vadd.f32 %v64_v22, %v63_v14  ;;  %v79_v31 = vadd.f32 %v78_v23, %v77_v15  ;;  %s1563_s6 = sld [smem:[#allocation2 + $0x47]]  ;;  %s1565_s7 = sld [smem:[#allocation2 + $0x4e]] }
  0x3d   :  { %v102_v32 = vmax.f32 %v100_v16, %v101_v24  ;;  %v116_v33 = vmax.f32 %v114_v17, %v115_v25  ;;  %v70_v34 = vadd.f32 %v69_v26, %v68_v18  ;;  %v84_v35 = vadd.f32 %v83_v27, %v82_v19  ;;  %3117 = sst [smem:[#allocation14_spill]] %s1541_s24  ;;  %s1567_s8 = sld [smem:[#allocation2 + $0x55]] }
  0x3e   :  { %v98_v36 = vrot.slane %v97_v28, 1  ;;  %v112_v37 = vrot.slane %v111_v29, 1  ;;  %v66_v38 = vrot.slane %v65_v30, 1  ;;  %v80_v39 = vrot.slane %v79_v31, 1  ;;  %3118 = sst [smem:[#allocation15_spill]] %s1543_s25  ;;  %s1569_s9 = sld [smem:[#allocation2 + $0x5c]] }
  0x3f   :  { %v103_v40 = vrot.slane %v102_v32, 2  ;;  %v117_v41 = vrot.slane %v116_v33, 2  ;;  %v71_v42 = vrot.slane %v70_v34, 2  ;;  %v85_v43 = vrot.slane %v84_v35, 2  ;;  %3119 = sst [smem:[#allocation16_spill]] %s1545_s26  ;;  %s1571_s10 = sld [smem:[#allocation2 + $0x1]] }
  0x40   :  { %v1513_v44 = vmax.f32 %v97_v28, %v98_v36  ;;  %v1515_v45 = vmax.f32 %v111_v29, %v112_v37  ;;  %v67_v46 = vadd.f32 %v66_v38, %v65_v30  ;;  %v81_v47 = vadd.f32 %v80_v39, %v79_v31  ;;  %3120 = sst [smem:[#allocation17_spill]] %s1547_s27  ;;  %s1575_s11 = sld [smem:[#allocation2 + $0x8]] }
  0x41   :  { %v104_v48 = vmax.f32 %v102_v32, %v103_v40  ;;  %v118_v49 = vmax.f32 %v116_v33, %v117_v41  ;;  %v72_v50 = vadd.f32 %v71_v42, %v70_v34  ;;  %v86_v51 = vadd.f32 %v85_v43, %v84_v35  ;;  %3121 = sst [smem:[#allocation18_spill]] %s1551_s29  ;;  %s1577_s12 = sld [smem:[#allocation2 + $0xf]] }
  0x42   :  { %v164_v52 = vsel %vm133_vm1, %v1515_v45, %v1513_v44  ;;  %v1520_v53 = vmul.f32 0.25, %v67_v46  ;;  %v1522_v54 = vmul.f32 0.25, %v81_v47  ;;  %v142_v4 = vlaneseq  ;;  %3122 = sst [smem:[#allocation19_spill]] %s1555_s4  ;;  %s1579_s13 = sld [smem:[#allocation2 + $0x16]] }
  0x43   :  { %267 = vrot.lane.b32.xlu0 %v164_v52, %s1431_s2  ;;  %168 = vrot.lane.b32.xlu1 %v164_v52, %s1432_s19  ;;  %v105_v55 = vrot.slane %v104_v48, 1  ;;  %v119_v56 = vrot.slane %v118_v49, 1  ;;  %v73_v57 = vrot.slane %v72_v50, 1  ;;  %v87_v58 = vrot.slane %v86_v51, 1  ;;  %3123 = sst [smem:[#allocation20_spill]] %s1557_s5  ;;  %s1581_s14 = sld [smem:[#allocation2 + $0x1d]] }
  0x44   :  { %v134_v59 = vsel %vm133_vm1, %v1522_v54, %v1520_v53  ;;  %3124 = sst [smem:[#allocation21_spill]] %s1561_s0  ;;  %v1573_v6 = vshrl.u32 %v142_v4, 7  ;;  %vm128_vm2 = vcmp.ge.s32.totalorder %v1559_v5, 3  ;;  %s1584_s15 = sld [smem:[#allocation2 + $0x24]]  ;;  %v3045_v8 = vmov 0  }
  0x45   :  { %v1527_v60 = vmax.f32 %v104_v48, %v105_v55  ;;  %v1529_v61 = vmax.f32 %v118_v49, %v119_v56  ;;  %v74_v62 = vadd.f32 %v73_v57, %v72_v50  ;;  %v88_v63 = vadd.f32 %v87_v58, %v86_v51  ;;  %3125 = sst [smem:[#allocation22_spill]] %s1563_s6  ;;  %s1586_s17 = sld [smem:[#allocation2 + $0x2b]] }
  0x46   :  { %3126 = sst [smem:[#allocation23_spill]] %s1565_s7  ;;  %3129 = vst [vmem:[#allocation26_spill] sm:$0xff] %v1573_v6  ;;  %s1588_s18 = sld [smem:[#allocation2 + $0x2]]  ;;  %v1593_v7 = vsub.s32 0, %v1573_v6  ;;  %v1600_v9 = vsel %vm128_vm2, 1, %v3045_v8  ;;  %v1603_v10 = vsub.s32 1, %v1573_v6  ;;  %v181_v13 = vstv %s1541_s24 }
  0x47   :  { %138 = vrot.lane.b32.xlu0 %v134_v59, %s1432_s19  ;;  %v165_v0 = vsel %vm133_vm1, %v1529_v61, %v1527_v60  ;;  %v1534_v1 = vmul.f32 0.25, %v74_v62  ;;  %v1536_v2 = vmul.f32 0.25, %v88_v63  ;;  %3127 = sst [smem:[#allocation24_spill]] %s1567_s8  ;;  %vm246_vm3 = vcmp.ge.s32.totalorder %v1559_v5, 2  ;;  %s1612_s1 = sld [smem:[#allocation2]] }
  0x48   :  { %170 = vrot.lane.b32.xlu1 %v165_v0, %s1432_s19  ;;  %3128 = sst [smem:[#allocation25_spill]] %s1571_s10  ;;  %3132 = vst [vmem:[#allocation29_spill] sm:$0xff] %v1593_v7  ;;  %3134 = vst [vmem:[#allocation31_spill] sm:$0xff] %v1603_v10  ;;  %s1614_s16 = sld [smem:[#allocation2 + $0x7]]  ;;  %v1618_v11 = vand.u32 127, %v142_v4  ;;  %v151_v12 = vrot.slane %v1600_v9, %v1593_v7  ;;  %v191_v14 = vstv %s1543_s25  ;;  %v155_v15 = vrot.slane %v1600_v9, %v1603_v10 }
  0x49   :  { %v135_v3 = vsel %vm133_vm1, %v1536_v2, %v1534_v1  ;;  %3130 = sst [smem:[#allocation27_spill]] %s1575_s11  ;;  %s1616_s3 = sld [smem:[#allocation2 + $0xe]]  ;;  %v201_v16 = vstv %s1545_s26  ;;  %v211_v17 = vstv %s1547_s27  ;;  %v1633_v18 = vsel %vm246_vm3, 1, %v3045_v8 }
  0x4a   :  { %s1637_s24 = sld [smem:[#allocation2 + $0x2a]]  ;;  %v221_v19 = vstv %s1549_s28  ;;  %v231_v20 = vstv %s1551_s29  ;;  %v241_v21 = vstv %s1553_s30  ;;  %vm359_vm4 = vcmp.ge.s32.totalorder %v1559_v5, 1  ;;  %s1643_s25 = sld [smem:[#allocation2 + $0x33]] }
  0x4b   :  { %247 = vrot.lane.b32.xlu0 %v134_v59, %s1431_s2  ;;  %s1645_s27 = sld [smem:[#allocation2 + $0x3a]]  ;;  %s1651_s26 = sld [smem:[#allocation2 + $0x41]]  ;;  %v258_v26 = vrot.slane %v1633_v18, %v1593_v7  ;;  %v262_v27 = vrot.slane %v1633_v18, %v1603_v10  ;;  %v1671_v33 = vsel %vm359_vm4, 1, %v3045_v8  ;;  %vm654_vm5 = vcmp.lt.s32.totalorder %v1559_v5, 15 }
  0x4c   :  { %269 = vrot.lane.b32.xlu1 %v165_v0, %s1431_s2  ;;  %3131 = sst [smem:[#allocation28_spill]] %s1588_s18  ;;  %s1653_s29 = sld [smem:[#allocation2 + $0x48]]  ;;  %v371_v42 = vrot.slane %v1671_v33, %v1593_v7  ;;  %v375_v43 = vrot.slane %v1671_v33, %v1603_v10  ;;  %vm767_vm6 = vcmp.lt.s32.totalorder %v1559_v5, 14  ;;  %vm880_vm7 = vcmp.lt.s32.totalorder %v1559_v5, 13 }
  0x4d   :  { %s1661_s0 = sld [smem:[#allocation2 + $0x3]]  ;;  %s1663_s6 = sld [smem:[#allocation2 + $0x34]]  ;;  %v1730_v5 = vsel %vm767_vm6, 1, %v3045_v8  ;;  %vm144_vm8 = vcmp.lt.s32.totalorder %v1618_v11, 3  ;;  %vm1911_vm9 = vcmp.eq.s32.totalorder %v151_v12, 1  ;;  %vm1918_vm10 = vcmp.eq.s32.totalorder %v155_v15, 1 }
  0x4e   :  { %3137 = sst [smem:[#allocation34_spill]] %s1614_s16  ;;  %s1673_s7 = sld [smem:[#allocation2 + $0x4f]]  ;;  %vm251_vm11 = vcmp.lt.s32.totalorder %v1618_v11, 2  ;;  %vm1958_vm12 = vcmp.eq.s32.totalorder %v258_v26, 1  ;;  %vm1965_vm13 = vcmp.eq.s32.totalorder %v262_v27, 1  ;;  %vm364_vm14 = vcmp.lt.s32.totalorder %v1618_v11, 1 }
  0x4f   :  { %360 = vrot.lane.b32.xlu0 %v134_v59, %s1433_s20  ;;  %3138 = sst [smem:[#allocation35_spill]] %s1616_s3  ;;  %s1635_s3 = sld [smem:[#allocation2 + $0x23]]  ;;  %vm2072_vm15 = vcmp.eq.s32.totalorder %v371_v42, 1  ;;  %vm2079_vm0 = vcmp.eq.s32.totalorder %v375_v43, 1  ;;  %vm659_vm2 = vcmp.lt.s32.totalorder %v1618_v11, 127 }
  0x50   :  { %249 = vrot.lane.b32.xlu1 %v135_v3, %s1431_s2  ;;  %s1590_s2 = sld [smem:[#allocation2 + $0x9]]  ;;  %3141 = sst [smem:[#allocation38_spill]] %s1637_s24 }
  0x51   :  { %3142 = sst [smem:[#allocation39_spill]] %s1643_s25  ;;  %s1681_s11 = sld [smem:[#allocation2 + $0x5d]] }
  0x52   :  { %3143 = sst [smem:[#allocation40_spill]] %s1645_s27  ;;  %s1675_s4 = sld [smem:[#allocation2 + $0x56]] }
  0x53   :  { %140 = vrot.lane.b32.xlu0 %v135_v3, %s1432_s19  ;;  %s1595_s19 = sld [smem:[#allocation2 + $0x10]]  ;;  %3145 = sst [smem:[#allocation42_spill]] %s1653_s29  ;;  %v473_v63 = vstv %s1661_s0 }
  0x54   :  { %362 = vrot.lane.b32.xlu1 %v135_v3, %s1433_s20  ;;  %3144 = sst [smem:[#allocation41_spill]] %s1651_s26  ;;  %s1697_s18 = sld [smem:[#allocation2 + $0x4a]]  ;;  %v475_v62 = vmul.f32 %v473_v63, %v1534_v1  ;;  %v477_v51 = vmul.f32 %v473_v63, %v1536_v2  ;;  %v476_v56 = vmul.f32 %v473_v63, %v1522_v54 }
  0x55   :  { %3140 = sst [smem:[#allocation37_spill]] %s1635_s3  ;;  %s1705_s5 = sld [smem:[#allocation2 + $0x3b]] }
  0x56   :  { %3147 = sst [smem:[#allocation43_spill]] %s1673_s7  ;;  %s1711_s10 = sld [smem:[#allocation2 + $0x4]] }
  0x57   :  { %380 = vrot.lane.b32.xlu0 %v164_v52, %s1433_s20  ;;  %3151 = sst [smem:[#allocation45_spill]] %s1681_s11  ;;  %s1717_s3 = sld [smem:[#allocation2 + $0x11]] }
  0x58   :  { %382 = vrot.lane.b32.xlu1 %v165_v0, %s1433_s20  ;;  %s1597_s20 = sld [smem:[#allocation2 + $0x17]]  ;;  %3149 = sst [smem:[#allocation44_spill]] %s1675_s4 }
  0x59   :  { %3133 = sst [smem:[#allocation30_spill]] %s1595_s19  ;;  %s1703_s19 = sld [smem:[#allocation2 + $0xa]] }
  0x5a   :  { %3152 = sst [smem:[#allocation46_spill]] %s1697_s18  ;;  %s1743_s11 = sld [smem:[#allocation2 + $0x36]] }
  0x5b   :  { %655 = vrot.lane.b32.xlu0 %v134_v59, %s1434_s21  ;;  %s1739_s0 = sld [smem:[#allocation2 + $0x35]]  ;;  %s1745_s4 = sld [smem:[#allocation2 + $0x6]]  ;;  %v505_v41 = vstv %s1705_s5 }
  0x5c   :  { %657 = vrot.lane.b32.xlu1 %v135_v3, %s1434_s21  ;;  %3153 = sst [smem:[#allocation47_spill]] %s1711_s10  ;;  %s1759_s7 = sld [smem:[#allocation2 + $0x37]]  ;;  %v507_v4 = vmul.f32 %v505_v41, %v1527_v60  ;;  %v509_v36 = vmul.f32 %v505_v41, %v1529_v61 }
  0x5d   :  { %s1761_s26 = sld [smem:[#allocation2 + $0xb]]  ;;  %s1768_s27 = sld [smem:[#allocation2 + $0x1f]]  ;;  %v525_v37 = vstv %s1717_s3 }
  0x5e   :  { %s1770_s25 = sld [smem:[#allocation2 + $0x50]]  ;;  %s1781_s5 = sld [smem:[#allocation2 + $0x3c]] }
  0x5f   :  { %675 = vrot.lane.b32.xlu0 %v164_v52, %s1434_s21  ;;  %v499_v46 = vstv %s1703_s19  ;;  %s1783_s19 = sld [smem:[#allocation2 + $0xc]]  ;;  %s1785_s18 = sld [smem:[#allocation2 + $0x3d]] }
  0x60   :  { %677 = vrot.lane.b32.xlu1 %v165_v0, %s1434_s21  ;;  %s1605_s21 = sld [smem:[#allocation2 + $0x1e]]  ;;  %3155 = sst [smem:[#allocation49_spill]] %s1743_s11 }
  0x61   :  { %3156 = sst [smem:[#allocation50_spill]] %s1745_s4  ;;  %s1787_s10 = sld [smem:[#allocation2 + $0xd]] }
  0x62   :  { %3157 = sst [smem:[#allocation51_spill]] %s1759_s7  ;;  %s1793_s3 = sld [smem:[#allocation2 + $0x3e]] }
  0x63   :  { %768 = vrot.lane.b32.xlu0 %v134_v59, %s1435_s22  ;;  %3158 = sst [smem:[#allocation52_spill]] %s1761_s26  ;;  %s1817_s16 = sld [smem:[#allocation2 + $0x26]] }
  0x64   :  { %770 = vrot.lane.b32.xlu1 %v135_v3, %s1435_s22  ;;  %3159 = sst [smem:[#allocation53_spill]] %s1781_s5  ;;  %s1807_s29 = sld [smem:[#allocation2 + $0x43]] }
  0x65   :  { %3160 = sst [smem:[#allocation54_spill]] %s1783_s19  ;;  %s1815_s24 = sld [smem:[#allocation2 + $0x13]] }
  0x66   :  { %3161 = sst [smem:[#allocation55_spill]] %s1785_s18  ;;  %s1819_s8 = sld [smem:[#allocation2 + $0x44]] }
  0x67   :  { %788 = vrot.lane.b32.xlu0 %v164_v52, %s1435_s22  ;;  %3162 = sst [smem:[#allocation56_spill]] %s1787_s10  ;;  %s1825_s7 = sld [smem:[#allocation2 + $0x14]] }
  0x68   :  { %790 = vrot.lane.b32.xlu1 %v165_v0, %s1435_s22  ;;  %s1607_s22 = sld [smem:[#allocation2 + $0x25]]  ;;  %3163 = sst [smem:[#allocation57_spill]] %s1793_s3 }
  0x69   :  { %s1827_s26 = sld [smem:[#allocation2 + $0x45]]  ;;  %s1841_s4 = sld [smem:[#allocation2 + $0x5e]] }
  0x6a   :  { %3165 = sst [smem:[#allocation59_spill]] %s1807_s29  ;;  %s1849_s11 = sld [smem:[#allocation2 + $0x51]] }
  0x6b   :  { %881 = vrot.lane.b32.xlu0 %v134_v59, %s1436_s23  ;;  %v1733_v59 = vsel %vm880_vm7, 1, %v3045_v8  ;;  %3166 = sst [smem:[#allocation60_spill]] %s1815_s24  ;;  %s1861_s18 = sld [smem:[#allocation2 + $0x21]] }
  0x6c   :  { %883 = vrot.lane.b32.xlu1 %v135_v3, %s1436_s23  ;;  %3167 = sst [smem:[#allocation61_spill]] %s1819_s8  ;;  %s1863_s3 = sld [smem:[#allocation2 + $0x52]] }
  0x6d   :  { %3168 = sst [smem:[#allocation62_spill]] %s1825_s7  ;;  %s1877_s29 = sld [smem:[#allocation2 + $0x53]] }
  0x6e   :  { %3135 = sst [smem:[#allocation32_spill]] %s1607_s22  ;;  %s1624_s22 = sld [smem:[#allocation2 + $0x15]] }
  0x6f   :  { %901 = vrot.lane.b32.xlu0 %v164_v52, %s1436_s23  ;;  %v1727_v52 = vsel %vm654_vm5, 1, %v3045_v8  ;;  %v474_v8 = vmul.f32 %v473_v63, %v1520_v53  ;;  %v501_v63 = vmul.f32 %v499_v46, %v1534_v1  ;;  %3169 = sst [smem:[#allocation63_spill]] %s1827_s26  ;;  %s1879_s10 = sld [smem:[#allocation2 + $0x27]]  ;;  %vm772_vm5 = vcmp.lt.s32.totalorder %v1618_v11, 126 }
  0x70   :  { %903 = vrot.lane.b32.xlu1 %v165_v0, %s1436_s23  ;;  %s1610_s23 = sld [smem:[#allocation2 + $0x2c]]  ;;  %v479_v0 = vstv %s1663_s6  ;;  %s1741_s6 = sld [smem:[#allocation2 + $0x5]] }
  0x71   :  { %v481_v49 = vmul.f32 %v479_v0, %v1527_v60  ;;  %v483_v57 = vmul.f32 %v479_v0, %v1529_v61  ;;  %v480_v58 = vmul.f32 %v479_v0, %v1513_v44  ;;  %v482_v3 = vmul.f32 %v479_v0, %v1515_v45  ;;  %3171 = sst [smem:[#allocation65_spill]] %s1849_s11  ;;  %s1897_s26 = sld [smem:[#allocation2 + $0x49]] }
  0x72   :  { %v503_v0 = vmul.f32 %v499_v46, %v1536_v2  ;;  %v511_v30 = vadd.f32 %v507_v4, %v501_v63  ;;  %3173 = sst [smem:[#allocation67_spill]] %s1861_s18  ;;  %s1895_s7 = sld [smem:[#allocation2 + $0x18]] }
  0x73   :  { %v485_v40 = vadd.f32 %v481_v49, %v475_v62  ;;  %v487_v47 = vadd.f32 %v483_v57, %v477_v51  ;;  %v484_v39 = vadd.f32 %v480_v58, %v474_v8  ;;  %v486_v38 = vadd.f32 %v482_v3, %v476_v56  ;;  %s1906_s24 = sld [smem:[#allocation2 + $0x29]]  ;;  %s1934_s11 = sld [smem:[#allocation2 + $0x5f]] }
  0x74   :  { %v500_v8 = vmul.f32 %v499_v46, %v1520_v53  ;;  %v502_v49 = vmul.f32 %v499_v46, %v1522_v54  ;;  %v506_v51 = vmul.f32 %v505_v41, %v1513_v44  ;;  %v508_v56 = vmul.f32 %v505_v41, %v1515_v45  ;;  %s1938_s8 = sld [smem:[#allocation2 + $0x2f]]  ;;  %s1940_s19 = sld [smem:[#allocation2 + $0x60]] }
  0x75   :  { %v527_v57 = vmul.f32 %v525_v37, %v1534_v1  ;;  %v529_v58 = vmul.f32 %v525_v37, %v1536_v2  ;;  %v1802_v46 = vsel %vm133_vm1, %v487_v47, %v485_v40  ;;  %v1812_v31 = vsel %vm133_vm1, %v486_v38, %v484_v39  ;;  %s1942_s5 = sld [smem:[#allocation2 + $0x30]]  ;;  %s1953_s18 = sld [smem:[#allocation2 + $0x61]] }
  0x76   :  { %3136 = sst [smem:[#allocation33_spill]] %s1610_s23  ;;  %s1626_s23 = sld [smem:[#allocation2 + $0x1c]]  ;;  %v513_v29 = vadd.f32 %v509_v36, %v503_v0  ;;  %v577_v40 = vstv %s1768_s27  ;;  %v583_v47 = vstv %s1770_s25  ;;  %v510_v41 = vadd.f32 %v506_v51, %v500_v8 }
  0x77   :  { %3154 = sst [smem:[#allocation48_spill]] %s1741_s6  ;;  %v512_v48 = vadd.f32 %v508_v56, %v502_v49  ;;  %v526_v38 = vmul.f32 %v525_v37, %v1520_v53  ;;  %v528_v36 = vmul.f32 %v525_v37, %v1522_v54  ;;  %s1833_s25 = sld [smem:[#allocation2 + $0x20]]  ;;  %v579_v63 = vmul.f32 %v577_v40, %v1534_v1 }
  0x78   :  { %s1823_s6 = sld [smem:[#allocation2 + $0x57]]  ;;  %v581_v0 = vmul.f32 %v577_v40, %v1536_v2  ;;  %v585_v8 = vmul.f32 %v583_v47, %v1527_v60  ;;  %v587_v49 = vmul.f32 %v583_v47, %v1529_v61  ;;  %s1839_s27 = sld [smem:[#allocation2 + $0x2d]]  ;;  %v1844_v37 = vsel %vm133_vm1, %v513_v29, %v511_v30 }
  0x79   :  { %3180 = sst [smem:[#allocation70_spill]] %s1934_s11  ;;  %s3208_s11 = sld [smem:[#allocation21_spill]] }
  0x7a   :  { %v589_v56 = vadd.f32 %v585_v8, %v579_v63  ;;  %3181 = sst [smem:[#allocation71_spill]] %s1938_s8  ;;  %s3217_s8 = sld [smem:[#allocation23_spill]] }
  0x7b   :  { %3182 = sst [smem:[#allocation72_spill]] %s1942_s5  ;;  %s3223_s28 = sld [smem:[#allocation24_spill]] }
  0x7c   :  { %3139 = sst [smem:[#allocation36_spill]] %s1626_s23  ;;  %s1719_s23 = sld [smem:[#allocation2 + $0x42]] }
  0x7d   :  { %3170 = sst [smem:[#allocation64_spill]] %s1833_s25  ;;  %s1904_s25 = sld [smem:[#allocation2 + $0x59]] }
  0x7e   :  { %3184 = sst [smem:[#allocation74_spill]] %s1953_s18  ;;  %s3209_s18 = sld [smem:[#allocation22_spill]] }
  0x7f   :  { %s3231_s30 = sld [smem:[#allocation25_spill]]  ;;  %s3233_s5 = sld [smem:[#allocation27_spill]] }
  0x82   :  { %v531_v55 = vstv %s1719_s23  ;;  %s1799_s23 = sld [smem:[#allocation2 + $0x12]] }
  0x83   :  { %v533_v62 = vmul.f32 %v531_v55, %v1527_v60  ;;  %v535_v3 = vmul.f32 %v531_v55, %v1529_v61  ;;  %v532_v39 = vmul.f32 %v531_v55, %v1513_v44  ;;  %v534_v4 = vmul.f32 %v531_v55, %v1515_v45 }
  0x84   :  { %v591_v55 = vadd.f32 %v587_v49, %v581_v0 }
  0x85   :  { %v537_v34 = vadd.f32 %v533_v62, %v527_v57  ;;  %v539_v32 = vadd.f32 %v535_v3, %v529_v58  ;;  %v1854_v62 = vsel %vm133_vm1, %v512_v48, %v510_v41  ;;  %v536_v30 = vadd.f32 %v532_v39, %v526_v38 }
  0x86   :  { %v538_v51 = vadd.f32 %v534_v4, %v528_v36  ;;  %v578_v48 = vmul.f32 %v577_v40, %v1520_v53  ;;  %v603_v41 = vstv %s1817_s16  ;;  %v586_v38 = vmul.f32 %v583_v47, %v1515_v45  ;;  %s1887_s16 = sld [smem:[#allocation2 + $0x58]] }
  0x87   :  { %v1858_v35 = vsel %vm133_vm1, %v539_v32, %v537_v34  ;;  %v580_v32 = vmul.f32 %v577_v40, %v1522_v54  ;;  %v584_v34 = vmul.f32 %v583_v47, %v1513_v44  ;;  %v609_v36 = vstv %s1823_s6  ;;  %s1889_s6 = sld [smem:[#allocation2 + $0x28]] }
  0x88   :  { %3164 = sst [smem:[#allocation58_spill]] %s1799_s23  ;;  %3172 = vst [vmem:[#allocation66_spill] sm:$0xff] %v1858_v35  ;;  %s1867_s23 = sld [smem:[#allocation2 + $0x22]]  ;;  %v1882_v8 = vsel %vm133_vm1, %v538_v51, %v536_v30  ;;  %v605_v49 = vmul.f32 %v603_v41, %v1534_v1  ;;  %v607_v47 = vmul.f32 %v603_v41, %v1536_v2  ;;  %v611_v63 = vmul.f32 %v609_v36, %v1527_v60 }
  0x89   :  { %3174 = vst [vmem:[#allocation68_spill] sm:$0xff] %v1882_v8  ;;  %v613_v0 = vmul.f32 %v609_v36, %v1529_v61  ;;  %v629_v39 = vstv %s1839_s27  ;;  %v635_v4 = vstv %s1841_s4  ;;  %v1901_v51 = vsel %vm133_vm1, %v591_v55, %v589_v56  ;;  %s1922_s4 = sld [smem:[#allocation2 + $0x5a]]  ;;  %s1928_s27 = sld [smem:[#allocation2 + $0x2e]] }
  0x8a   :  { %3175 = vst [vmem:[#allocation69_spill] sm:$0xff] %v1901_v51  ;;  %v588_v40 = vadd.f32 %v584_v34, %v578_v48  ;;  %v590_v29 = vadd.f32 %v586_v38, %v580_v32  ;;  %v604_v56 = vmul.f32 %v603_v41, %v1520_v53  ;;  %v606_v48 = vmul.f32 %v603_v41, %v1522_v54 }
  0x8b   :  { %v610_v32 = vmul.f32 %v609_v36, %v1513_v44  ;;  %v612_v12 = vmul.f32 %v609_v36, %v1515_v45  ;;  %v631_v34 = vmul.f32 %v629_v39, %v1534_v1  ;;  %v633_v9 = vmul.f32 %v629_v39, %v1536_v2 }
  0x8c   :  { %v637_v15 = vmul.f32 %v635_v4, %v1527_v60  ;;  %v639_v38 = vmul.f32 %v635_v4, %v1529_v61  ;;  %v615_v41 = vadd.f32 %v611_v63, %v605_v49  ;;  %v617_v57 = vadd.f32 %v613_v0, %v607_v47 }
  0x8d   :  { %v630_v36 = vmul.f32 %v629_v39, %v1520_v53  ;;  %v632_v50 = vmul.f32 %v629_v39, %v1522_v54  ;;  %v636_v28 = vmul.f32 %v635_v4, %v1513_v44  ;;  %v638_v25 = vmul.f32 %v635_v4, %v1515_v45 }
  0x8e   :  { %v1951_v49 = vsel %vm133_vm1, %v590_v29, %v588_v40  ;;  %v614_v47 = vadd.f32 %v610_v32, %v604_v56  ;;  %v616_v58 = vadd.f32 %v612_v12, %v606_v48  ;;  %v641_v56 = vadd.f32 %v637_v15, %v631_v34 }
  0x8f   :  { %3183 = vst [vmem:[#allocation73_spill] sm:$0xff] %v1951_v49  ;;  %v643_v48 = vadd.f32 %v639_v38, %v633_v9  ;;  %v1972_v32 = vsel %vm133_vm1, %v617_v57, %v615_v41  ;;  %v551_v12 = vstv %s1895_s7  ;;  %v557_v0 = vstv %s1897_s26  ;;  %s3206_s26 = sld [smem:[#allocation19_spill]]  ;;  %s3207_s7 = sld [smem:[#allocation20_spill]] }
  0x90   :  { %3189 = vst [vmem:[#allocation75_spill] sm:$0xff] %v1972_v32  ;;  %v640_v27 = vadd.f32 %v636_v28, %v630_v36  ;;  %v642_v23 = vadd.f32 %v638_v25, %v632_v50  ;;  %v1984_v34 = vsel %vm133_vm1, %v616_v58, %v614_v47  ;;  %v552_v41 = vmul.f32 %v551_v12, %v1520_v53 }
  0x91   :  { %3190 = vst [vmem:[#allocation76_spill] sm:$0xff] %v1984_v34  ;;  %v1988_v15 = vsel %vm133_vm1, %v643_v48, %v641_v56  ;;  %v558_v28 = vmul.f32 %v557_v0, %v1513_v44  ;;  %v2012_v36 = vmul.f32 %v551_v12, %v1522_v54  ;;  %v2018_v53 = vmul.f32 %v557_v0, %v1527_v60 }
  0x92   :  { %3191 = vst [vmem:[#allocation77_spill] sm:$0xff] %v1988_v15  ;;  %v2005_v44 = vsel %vm133_vm1, %v642_v23, %v640_v27  ;;  %v2021_v23 = vmul.f32 %v557_v0, %v1515_v45  ;;  %v2024_v27 = vmul.f32 %v557_v0, %v1529_v61  ;;  %v3245_v39 = vstv %s1579_s13  ;;  %s3276_s13 = sld [smem:[#allocation32_spill]] }
  0x93   :  { %3195 = vst [vmem:[#allocation78_spill] sm:$0xff] %v2005_v44  ;;  %3197 = vst [vmem:[#allocation80_spill] sm:$0xff] %v2012_v36  ;;  %v3237_v36 = vstv %s3223_s28  ;;  %v3262_v55 = vrot.slane %v1727_v52, %v1593_v7  ;;  %s3360_s28 = sld [smem:[#allocation48_spill]] }
  0x94   :  { %3200 = vst [vmem:[#allocation82_spill] sm:$0xff] %v2018_v53  ;;  %3201 = vst [vmem:[#allocation83_spill] sm:$0xff] %v2021_v23 }
  0x95   :  { %3202 = vst [vmem:[#allocation84_spill] sm:$0xff] %v2024_v27  ;;  %v3221_v38 = vstv %s3206_s26  ;;  %v3224_v40 = vstv %s3207_s7  ;;  %vm2229_vm3 = vcmp.eq.s32.totalorder %v3262_v55, 1  ;;  %s3328_s26 = sld [smem:[#allocation41_spill]]  ;;  %s3341_s7 = sld [smem:[#allocation43_spill]] }
  0xb5   :  { %v268_v30 = vpop.permute.xlu0 %267  ;;  %v169_v63 = vpop.permute.xlu1 %168 }
  0xb9   :  { %v1979_v22 = vpop.permute.xlu0 %138 }
  0xba   :  { %v171_v9 = vpop.permute.xlu1 %170 }
  0xbb   :  { %v172_v25 = vsel %vm144_vm8, %v169_v63, %v171_v9  ;;  %v173_v50 = vsel %vm144_vm8, %v171_v9, %v169_v63  ;;  %v2009_v9 = vmul.f32 %v551_v12, %v1534_v1  ;;  %v2026_v1 = vadd.f32 %v558_v28, %v552_v41 }
  0xbc   :  { %v174_v47 = vsel %vm1911_vm9, %v173_v50, 0.0  ;;  %v175_v56 = vsel %vm1918_vm10, %v172_v25, 0.0  ;;  %v2015_v50 = vmul.f32 %v551_v12, %v1536_v2 }
  0xbd   :  { %v248_v48 = vpop.permute.xlu0 %247  ;;  %3196 = vst [vmem:[#allocation79_spill] sm:$0xff] %v2009_v9  ;;  %3203 = vst [vmem:[#allocation85_spill] sm:$0xff] %v2026_v1  ;;  %v2030_v54 = vmul.f32 %v181_v13, %v174_v47  ;;  %v2034_v2 = vmul.f32 %v181_v13, %v175_v56  ;;  %v2038_v12 = vmul.f32 %v191_v14, %v174_v47 }
  0xbe   :  { %3199 = vst [vmem:[#allocation81_spill] sm:$0xff] %v2015_v50  ;;  %v270_v25 = vpop.permute.xlu1 %269  ;;  %v2042_v45 = vmul.f32 %v191_v14, %v175_v56  ;;  %v2046_v60 = vmul.f32 %v201_v16, %v174_v47  ;;  %v2050_v61 = vmul.f32 %v201_v16, %v175_v56  ;;  %v2059_v14 = vmul.f32 %v211_v17, %v174_v47 }
  0xbf   :  { %v271_v13 = vsel %vm251_vm11, %v268_v30, %v270_v25  ;;  %v272_v0 = vsel %vm251_vm11, %v270_v25, %v268_v30  ;;  %v2063_v41 = vmul.f32 %v211_v17, %v175_v56  ;;  %v2093_v63 = vmul.f32 %v231_v20, %v174_v47 }
  0xc0   :  { %3205 = vst [vmem:[#allocation86_spill] sm:$0xff] %v2046_v60  ;;  %v273_v16 = vsel %vm1958_vm12, %v272_v0, 0.0  ;;  %v274_v28 = vsel %vm1965_vm13, %v271_v13, 0.0  ;;  %v2085_v13 = vmul.f32 %v221_v19, %v174_v47  ;;  %v2089_v0 = vmul.f32 %v221_v19, %v175_v56 }
  0xc1   :  { %v361_v30 = vpop.permute.xlu0 %360  ;;  %3216 = vst [vmem:[#allocation89_spill] sm:$0xff] %v2093_v63  ;;  %v2097_v42 = vmul.f32 %v231_v20, %v175_v56  ;;  %v2101_v43 = vmul.f32 %v241_v21, %v174_v47  ;;  %v2105_v58 = vmul.f32 %v241_v21, %v175_v56  ;;  %v2109_v57 = vmul.f32 %v3221_v38, %v273_v16 }
  0xc2   :  { %3214 = vst [vmem:[#allocation87_spill] sm:$0xff] %v2085_v13  ;;  %3215 = vst [vmem:[#allocation88_spill] sm:$0xff] %v2089_v0  ;;  %v250_v33 = vpop.permute.xlu1 %249  ;;  %v3222_v19 = vmov %v3221_v38  ;;  %v2117_v24 = vmul.f32 %v3224_v40, %v273_v16  ;;  %v3225_v20 = vmov %v3224_v40  ;;  %v3226_v47 = vstv %s3208_s11  ;;  %s3345_s11 = sld [smem:[#allocation44_spill]] }
  0xc3   :  { %3218 = vst [vmem:[#allocation90_spill] sm:$0xff] %v2097_v42  ;;  %3219 = vst [vmem:[#allocation91_spill] sm:$0xff] %v2101_v43  ;;  %v2113_v29 = vmul.f32 %v3222_v19, %v274_v28  ;;  %v2121_v18 = vmul.f32 %v3225_v20, %v274_v28  ;;  %v2125_v26 = vmul.f32 %v3226_v47, %v273_v16  ;;  %v3228_v21 = vmov %v3226_v47 }
  0xc4   :  { %3220 = vst [vmem:[#allocation92_spill] sm:$0xff] %v2105_v58  ;;  %v2129_v38 = vmul.f32 %v3228_v21, %v274_v28  ;;  %v3229_v56 = vstv %s3209_s18  ;;  %v252_v40 = vsel %vm251_vm11, %v248_v48, %v250_v33  ;;  %v253_v20 = vsel %vm251_vm11, %v250_v33, %v248_v48  ;;  %s3316_s18 = sld [smem:[#allocation37_spill]] }
  0xc5   :  { %3227 = vst [vmem:[#allocation93_spill] sm:$0xff] %v2125_v26  ;;  %v317_v19 = vmul.f32 %v3229_v56, %v273_v16  ;;  %v3230_v6 = vmov %v3229_v56  ;;  %v141_v44 = vpop.permute.xlu0 %140  ;;  %v3232_v47 = vstv %s3217_s8  ;;  %v266_v56 = vsel %vm1965_vm13, %v252_v40, 0.0  ;;  %s3359_s8 = sld [smem:[#allocation47_spill]] }
  0xc6   :  { %v318_v1 = vmul.f32 %v3230_v6, %v274_v28  ;;  %v2141_v27 = vmul.f32 %v3232_v47, %v273_v16  ;;  %v3235_v21 = vmov %v3232_v47  ;;  %v265_v6 = vsel %vm1958_vm12, %v253_v20, 0.0  ;;  %v363_v23 = vpop.permute.xlu1 %362 }
  0xc7   :  { %v2145_v50 = vmul.f32 %v3235_v21, %v274_v28  ;;  %v2153_v48 = vmul.f32 %v3237_v36, %v273_v16  ;;  %v3239_v33 = vmov %v3237_v36  ;;  %v3241_v47 = vstv %s1569_s9  ;;  %s3256_s9 = sld [smem:[#allocation28_spill]] }
  0xc8   :  { %3234 = vst [vmem:[#allocation94_spill] sm:$0xff] %v2141_v27  ;;  %v2157_v15 = vmul.f32 %v3239_v33, %v274_v28  ;;  %v2161_v53 = vmul.f32 %v3241_v47, %v273_v16  ;;  %v3243_v21 = vmov %v3241_v47  ;;  %v313_v20 = vmul.f32 %v3245_v39, %v265_v6 }
  0xc9   :  { %3236 = vst [vmem:[#allocation95_spill] sm:$0xff] %v2145_v50  ;;  %3238 = vst [vmem:[#allocation96_spill] sm:$0xff] %v2153_v48  ;;  %v2165_v9 = vmul.f32 %v3243_v21, %v274_v28  ;;  %v3246_v43 = vmov %v3245_v39  ;;  %v145_v40 = vsel %vm144_vm8, %v1979_v22, %v141_v44  ;;  %v146_v36 = vsel %vm144_vm8, %v141_v44, %v1979_v22 }
  0xca   :  { %3240 = vst [vmem:[#allocation97_spill] sm:$0xff] %v2157_v15  ;;  %3242 = vst [vmem:[#allocation98_spill] sm:$0xff] %v2161_v53  ;;  %v314_v4 = vmul.f32 %v3246_v43, %v266_v56  ;;  %v3247_v33 = vstv %s3231_s30  ;;  %v3249_v47 = vstv %s3233_s5  ;;  %v381_v53 = vpop.permute.xlu0 %380  ;;  %v383_v58 = vpop.permute.xlu1 %382  ;;  %vm885_vm8 = vcmp.lt.s32.totalorder %v1618_v11, 125  ;;  %s3361_s30 = sld [smem:[#allocation49_spill]]  ;;  %s3362_s5 = sld [smem:[#allocation50_spill]] }
  0xcb   :  { %3244 = vst [vmem:[#allocation99_spill] sm:$0xff] %v2165_v9  ;;  %v2179_v34 = vmul.f32 %v3247_v33, %v265_v6  ;;  %v3248_v16 = vmov %v3247_v33  ;;  %v2187_v21 = vmul.f32 %v3249_v47, %v265_v6  ;;  %v3250_v43 = vmov %v3249_v47 }
  0xcc   :  { %v2183_v28 = vmul.f32 %v3248_v16, %v266_v56  ;;  %v2191_v39 = vmul.f32 %v3250_v43, %v266_v56  ;;  %v3251_v9 = vstv %s1577_s12  ;;  %v2202_v16 = vadd.f32 %v317_v19, %v313_v20  ;;  %s3261_s12 = sld [smem:[#allocation30_spill]] }
  0xcd   :  { %v2196_v22 = vmul.f32 %v3251_v9, %v265_v6  ;;  %v3253_v44 = vmov %v3251_v9  ;;  %v2204_v47 = vadd.f32 %v318_v1, %v314_v4  ;;  %v365_v43 = vsel %vm364_vm14, %v361_v30, %v363_v23 }
  0xce   :  { %v2200_v33 = vmul.f32 %v3253_v44, %v266_v56  ;;  %3254 = vst [vmem:[#allocation101_spill] sm:$0xff] %v2202_v16  ;;  %v366_v9 = vsel %vm364_vm14, %v363_v23, %v361_v30  ;;  %v158_v44 = vsel %vm1911_vm9, %v146_v36, 0.0  ;;  %v159_v19 = vsel %vm1918_vm10, %v145_v40, 0.0 }
  0xcf   :  { %3252 = vst [vmem:[#allocation100_spill] sm:$0xff] %v2196_v22  ;;  %3255 = vst [vmem:[#allocation102_spill] sm:$0xff] %v2204_v47  ;;  %v3257_v20 = vstv %s1581_s14  ;;  %v378_v16 = vsel %vm2072_vm15, %v366_v9, 0.0  ;;  %v379_v3 = vsel %vm2079_vm0, %v365_v43, 0.0  ;;  %v3265_v30 = vrot.slane %v1727_v52, %v1603_v10  ;;  %v656_v52 = vpop.permute.xlu0 %655  ;;  %s3283_s14 = sld [smem:[#allocation33_spill]] }
  0xd0   :  { %v2216_v1 = vmul.f32 %v3257_v20, %v265_v6  ;;  %v3259_v4 = vmov %v3257_v20  ;;  %v3268_v36 = vstv %s1584_s15  ;;  %s3287_s15 = sld [smem:[#allocation34_spill]]  ;;  %v3331_v25 = vrot.slane %v1733_v59, %v1603_v10 }
  0xd1   :  { %v2220_v47 = vmul.f32 %v3259_v4, %v266_v56  ;;  %vm2236_vm4 = vcmp.eq.s32.totalorder %v3265_v30, 1  ;;  %v2242_v9 = vmul.f32 %v3268_v36, %v265_v6  ;;  %v3270_v43 = vmov %v3268_v36 }
  0xd2   :  { %3258 = vst [vmem:[#allocation103_spill] sm:$0xff] %v2216_v1  ;;  %v2246_v20 = vmul.f32 %v3270_v43, %v266_v56  ;;  %v3272_v4 = vstv %s1586_s17  ;;  %v3277_v30 = vstv %s3256_s9  ;;  %v3290_v1 = vstv %s1605_s21  ;;  %s3305_s17 = sld [smem:[#allocation36_spill]]  ;;  %s3324_s21 = sld [smem:[#allocation39_spill]] }
  0xd3   :  { %3260 = vst [vmem:[#allocation104_spill] sm:$0xff] %v2220_v47  ;;  %3269 = vst [vmem:[#allocation105_spill] sm:$0xff] %v2242_v9  ;;  %v2250_v55 = vmul.f32 %v3272_v4, %v265_v6  ;;  %v3274_v32 = vmov %v3272_v4  ;;  %v2258_v63 = vmul.f32 %v3277_v30, %v378_v16  ;;  %v3278_v49 = vmov %v3277_v30  ;;  %v658_v4 = vpop.permute.xlu1 %657  ;;  %v676_v35 = vpop.permute.xlu0 %675  ;;  %s3368_s9 = sld [smem:[#allocation51_spill]] }
  0xd4   :  { %3271 = vst [vmem:[#allocation106_spill] sm:$0xff] %v2246_v20  ;;  %v2254_v48 = vmul.f32 %v3274_v32, %v266_v56  ;;  %v2262_v36 = vmul.f32 %v3278_v49, %v379_v3  ;;  %v3279_v9 = vstv %s1612_s1  ;;  %v3281_v32 = vstv %s1590_s2  ;;  %s3291_s1 = sld [smem:[#allocation35_spill]]  ;;  %s3318_s2 = sld [smem:[#allocation38_spill]] }
  0xd5   :  { %3273 = vst [vmem:[#allocation107_spill] sm:$0xff] %v2250_v55  ;;  %v2266_v43 = vmul.f32 %v3279_v9, %v158_v44  ;;  %v3280_v15 = vmov %v3279_v9  ;;  %v2274_v56 = vmul.f32 %v3281_v32, %v378_v16  ;;  %v3282_v55 = vmov %v3281_v32 }
  0xd6   :  { %3275 = vst [vmem:[#allocation108_spill] sm:$0xff] %v2254_v48  ;;  %v2270_v6 = vmul.f32 %v3280_v15, %v159_v19  ;;  %v2278_v48 = vmul.f32 %v3282_v55, %v379_v3  ;;  %v3284_v30 = vstv %s3261_s12  ;;  %v3288_v9 = vstv %s1597_s20  ;;  %s3320_s20 = sld [smem:[#allocation42_spill]]  ;;  %s3372_s12 = sld [smem:[#allocation52_spill]] }
  0xd7   :  { %v2282_v20 = vmul.f32 %v3284_v30, %v378_v16  ;;  %v3286_v49 = vmov %v3284_v30  ;;  %v426_v15 = vmul.f32 %v3288_v9, %v378_v16  ;;  %v3289_v51 = vmov %v3288_v9  ;;  %v678_v26 = vpop.permute.xlu1 %677 }
  0xd8   :  { %v2286_v42 = vmul.f32 %v3286_v49, %v379_v3  ;;  %v427_v27 = vmul.f32 %v3289_v51, %v379_v3  ;;  %v2294_v32 = vmul.f32 %v3290_v1, %v378_v16  ;;  %v3293_v13 = vmov %v3290_v1 }
  0xd9   :  { %3285 = vst [vmem:[#allocation109_spill] sm:$0xff] %v2282_v20  ;;  %v2298_v55 = vmul.f32 %v3293_v13, %v379_v3  ;;  %v3295_v30 = vstv %s3276_s13  ;;  %v3299_v47 = vstv %s1624_s22  ;;  %v3301_v1 = vrot.slane %v1730_v5, %v1593_v7  ;;  %s3326_s22 = sld [smem:[#allocation40_spill]]  ;;  %s3376_s13 = sld [smem:[#allocation54_spill]] }
  0xda   :  { %3292 = vst [vmem:[#allocation110_spill] sm:$0xff] %v2294_v32  ;;  %v2303_v8 = vmul.f32 %v3295_v30, %v378_v16  ;;  %v3297_v49 = vmov %v3295_v30  ;;  %v208_v9 = vmul.f32 %v3299_v47, %v158_v44  ;;  %v3300_v0 = vmov %v3299_v47 }
  0xdb   :  { %3294 = vst [vmem:[#allocation111_spill] sm:$0xff] %v2298_v55  ;;  %v2307_v50 = vmul.f32 %v3297_v49, %v379_v3  ;;  %v209_v51 = vmul.f32 %v3300_v0, %v159_v19  ;;  %vm2316_vm6 = vcmp.eq.s32.totalorder %v3301_v1, 1  ;;  %v3304_v13 = vrot.slane %v1730_v5, %v1603_v10 }
  0xdc   :  { %3296 = vst [vmem:[#allocation112_spill] sm:$0xff] %v2303_v8  ;;  %v3308_v49 = vstv %s3283_s14  ;;  %v3314_v5 = vstv %s3291_s1  ;;  %vm2392_vm10 = vcmp.eq.s32.totalorder %v3331_v25, 1  ;;  %v3334_v17 = vstv %s3316_s18  ;;  %s3379_s14 = sld [smem:[#allocation55_spill]]  ;;  %s3381_s1 = sld [smem:[#allocation57_spill]] }
  0xdd   :  { %3298 = vst [vmem:[#allocation113_spill] sm:$0xff] %v2307_v50  ;;  %vm2323_vm7 = vcmp.eq.s32.totalorder %v3304_v13, 1  ;;  %v2329_v47 = vmul.f32 %v3308_v49, %v378_v16  ;;  %v3310_v0 = vmov %v3308_v49  ;;  %v3312_v50 = vstv %s3287_s15  ;;  %s3380_s15 = sld [smem:[#allocation56_spill]]  ;;  %s3388_s18 = sld [smem:[#allocation45_spill]] }
  0xde   :  { %v2333_v8 = vmul.f32 %v3310_v0, %v379_v3  ;;  %v2337_v1 = vmul.f32 %v3312_v50, %v158_v44  ;;  %v3313_v55 = vmov %v3312_v50  ;;  %v2345_v22 = vmul.f32 %v3314_v5, %v158_v44 }
  0xdf   :  { %3309 = vst [vmem:[#allocation114_spill] sm:$0xff] %v2329_v47  ;;  %v2341_v20 = vmul.f32 %v3313_v55, %v159_v19  ;;  %v3315_v13 = vmov %v3314_v5  ;;  %v2352_v16 = vadd.f32 %v2059_v14, %v208_v9  ;;  %v2355_v3 = vadd.f32 %v2063_v41, %v209_v51 }
  0xe0   :  { %3311 = vst [vmem:[#allocation115_spill] sm:$0xff] %v2333_v8  ;;  %v2349_v60 = vmul.f32 %v3315_v13, %v159_v19  ;;  %v384_v50 = vsel %vm364_vm14, %v381_v53, %v383_v58  ;;  %v385_v55 = vsel %vm364_vm14, %v383_v58, %v381_v53  ;;  %v660_v49 = vsel %vm659_vm2, %v656_v52, %v658_v4 }
  0xe1   :  { %3317 = vst [vmem:[#allocation116_spill] sm:$0xff] %v2352_v16  ;;  %3319 = vst [vmem:[#allocation117_spill] sm:$0xff] %v2355_v3  ;;  %v661_v14 = vsel %vm659_vm2, %v658_v4, %v656_v52  ;;  %v3321_v9 = vstv %s3305_s17  ;;  %v2376_v58 = vsel %vm2072_vm15, %v385_v55, 0.0  ;;  %v2380_v53 = vsel %vm2079_vm0, %v384_v50, 0.0  ;;  %v769_v52 = vpop.permute.xlu0 %768  ;;  %s1438_s17 = smov 48  }
  0xe2   :  { %v2368_v41 = vmul.f32 %v3321_v9, %v158_v44  ;;  %v3323_v51 = vmov %v3321_v9  ;;  %v3327_v4 = vrot.slane %v1733_v59, %v1593_v7  ;;  %v2398_v50 = vmul.f32 %v3334_v17, %v158_v44  ;;  %v771_v59 = vpop.permute.xlu1 %770 }
  0xe3   :  { %v2372_v0 = vmul.f32 %v3323_v51, %v159_v19  ;;  %v3336_v55 = vmov %v3334_v17  ;;  %v3338_v51 = vstv %s3318_s2  ;;  %v3343_v25 = vstv %s3320_s20  ;;  %s3394_s2 = sld [smem:[#allocation58_spill]]  ;;  %s3395_s20 = sld [smem:[#allocation59_spill]] }
  0xe4   :  { %3322 = vst [vmem:[#allocation118_spill] sm:$0xff] %v2368_v41  ;;  %vm2385_vm9 = vcmp.eq.s32.totalorder %v3327_v4, 1  ;;  %3335 = vst [vmem:[#allocation120_spill] sm:$0xff] %v2398_v50  ;;  %v2402_v9 = vmul.f32 %v3336_v55, %v159_v19  ;;  %v2406_v7 = vmul.f32 %v3338_v51, %v158_v44  ;;  %v3340_v4 = vmov %v3338_v51 }
  0xe5   :  { %3325 = vst [vmem:[#allocation119_spill] sm:$0xff] %v2372_v0  ;;  %v2410_v3 = vmul.f32 %v3340_v4, %v159_v19  ;;  %v430_v10 = vmul.f32 %v3343_v25, %v2376_v58  ;;  %v3344_v16 = vmov %v3343_v25  ;;  %v2420_v17 = vsel %vm2229_vm3, %v660_v49, 0.0 }
  0xe6   :  { %3337 = vst [vmem:[#allocation121_spill] sm:$0xff] %v2402_v9  ;;  %3339 = vst [vmem:[#allocation122_spill] sm:$0xff] %v2406_v7  ;;  %v431_v47 = vmul.f32 %v3344_v16, %v2380_v53  ;;  %v2424_v44 = vsel %vm2236_vm4, %v661_v14, 0.0  ;;  %v3346_v19 = vstv %s3324_s21  ;;  %v3348_v25 = vstv %s3326_s22  ;;  %s3396_s21 = sld [smem:[#allocation61_spill]]  ;;  %s3399_s22 = sld [smem:[#allocation60_spill]] }
  0xe7   :  { %3342 = vst [vmem:[#allocation123_spill] sm:$0xff] %v2410_v3  ;;  %v394_v55 = vmul.f32 %v3346_v19, %v2376_v58  ;;  %v3347_v51 = vmov %v3346_v19  ;;  %v2435_v7 = vmul.f32 %v3348_v25, %v2376_v58  ;;  %v3349_v16 = vmov %v3348_v25 }
  0xe8   :  { %v395_v4 = vmul.f32 %v3347_v51, %v2380_v53  ;;  %v2440_v49 = vmul.f32 %v3349_v16, %v2380_v53  ;;  %v3350_v8 = vstv %s3328_s26  ;;  %v2452_v19 = vadd.f32 %v430_v10, %v426_v15  ;;  %v789_v51 = vpop.permute.xlu0 %788  ;;  %s3400_s26 = sld [smem:[#allocation63_spill]] }
  0xe9   :  { %v2445_v3 = vmul.f32 %v3350_v8, %v2376_v58  ;;  %v3352_v14 = vmov %v3350_v8  ;;  %v2454_v9 = vadd.f32 %v431_v47, %v427_v27  ;;  %v3355_v25 = vstv %s3341_s7  ;;  %s3401_s7 = sld [smem:[#allocation62_spill]] }
  0xea   :  { %v2450_v50 = vmul.f32 %v3352_v14, %v2380_v53  ;;  %3353 = vst [vmem:[#allocation125_spill] sm:$0xff] %v2452_v19  ;;  %v2459_v41 = vmul.f32 %v3355_v25, %v2376_v58  ;;  %v3356_v16 = vmov %v3355_v25  ;;  %v679_v8 = vsel %vm659_vm2, %v676_v35, %v678_v26 }
  0xeb   :  { %3351 = vst [vmem:[#allocation124_spill] sm:$0xff] %v2445_v3  ;;  %3354 = vst [vmem:[#allocation126_spill] sm:$0xff] %v2454_v9  ;;  %v2464_v0 = vmul.f32 %v3356_v16, %v2380_v53  ;;  %v680_v14 = vsel %vm659_vm2, %v678_v26, %v676_v35  ;;  %v791_v3 = vpop.permute.xlu1 %790  ;;  %v3357_v10 = vstv %s3345_s11  ;;  %v773_v25 = vsel %vm772_vm5, %v769_v52, %v771_v59  ;;  %s1439_s11 = smov 32  }
  0xec   :  { %v2473_v27 = vmul.f32 %v3357_v10, %v2376_v58  ;;  %v3358_v15 = vmov %v3357_v10  ;;  %v774_v16 = vsel %vm772_vm5, %v771_v59, %v769_v52  ;;  %v2486_v9 = vsel %vm2229_vm3, %v679_v8, 0.0  ;;  %v882_v40 = vpop.permute.xlu0 %881 }
  0xed   :  { %v2478_v47 = vmul.f32 %v3358_v15, %v2380_v53  ;;  %v2490_v35 = vsel %vm2236_vm4, %v680_v14, 0.0  ;;  %v2494_v26 = vsel %vm2316_vm6, %v773_v25, 0.0  ;;  %v2498_v10 = vsel %vm2323_vm7, %v774_v16, 0.0 }
  0xee   :  { %v792_v52 = vsel %vm772_vm5, %v789_v51, %v791_v3  ;;  %v793_v23 = vsel %vm772_vm5, %v791_v3, %v789_v51  ;;  %v185_v59 = vadd.f32 %v2034_v2, %v2270_v6  ;;  %v284_v8 = vadd.f32 %v2113_v29, %v2183_v28 }
  0xef   :  { %v2510_v14 = vsel %vm2316_vm6, %v792_v52, 0.0  ;;  %v2514_v15 = vsel %vm2323_vm7, %v793_v23, 0.0  ;;  %v884_v25 = vpop.permute.xlu1 %883  ;;  %v397_v3 = vadd.f32 %v395_v4, %v2262_v36  ;;  %v3363_v51 = vstv %s3359_s8 }
  0xf0   :  { %v686_v16 = vmul.f32 %v3363_v51, %v2424_v44  ;;  %v886_v2 = vsel %vm885_vm8, %v882_v40, %v884_v25  ;;  %v887_v29 = vsel %vm885_vm8, %v884_v25, %v882_v40  ;;  %v286_v28 = vadd.f32 %v284_v8, %v185_v59  ;;  %v902_v25 = vpop.permute.xlu0 %901 }
  0xf1   :  { %v3364_v6 = vstv %s1739_s0  ;;  %v2529_v30 = vsel %vm2385_vm9, %v886_v2, 0.0  ;;  %v2533_v36 = vsel %vm2392_vm10, %v887_v29, 0.0  ;;  %v3365_v4 = vstv %s3360_s28 }
  0xf2   :  { %v690_v32 = vmul.f32 %v3364_v6, %v2490_v35  ;;  %v799_v52 = vmul.f32 %v3365_v4, %v2498_v10  ;;  %v3366_v23 = vstv %s3361_s30  ;;  %v399_v59 = vadd.f32 %v397_v3, %v286_v28 }
  0xf3   :  { %v803_v40 = vmul.f32 %v3366_v23, %v2514_v15  ;;  %v3367_v51 = vstv %s3362_s5  ;;  %v184_v2 = vadd.f32 %v2030_v54, %v2266_v43  ;;  %v904_v29 = vpop.permute.xlu1 %903  ;;  %v283_v4 = vadd.f32 %v2109_v57, %v2179_v34 }
  0xf4   :  { %v692_v8 = vadd.f32 %v690_v32, %v686_v16  ;;  %v912_v6 = vmul.f32 %v3367_v51, %v2533_v36  ;;  %v396_v23 = vadd.f32 %v394_v55, %v2258_v63  ;;  %v3369_v3 = vstv %s3359_s8  ;;  %s3416_s8 = sld [smem:[#allocation65_spill]] }
  0xf5   :  { %v805_v19 = vadd.f32 %v803_v40, %v799_v52  ;;  %v685_v16 = vmul.f32 %v3369_v3, %v2420_v17  ;;  %v905_v28 = vsel %vm885_vm8, %v902_v25, %v904_v29  ;;  %v906_v32 = vsel %vm885_vm8, %v904_v29, %v902_v25 }
  0xf6   :  { %v497_v54 = vadd.f32 %v1802_v46, %v399_v59  ;;  %v3370_v43 = vstv %s1739_s0  ;;  %v2562_v34 = vsel %vm2385_vm9, %v905_v28, 0.0  ;;  %v2566_v57 = vsel %vm2392_vm10, %v906_v32, 0.0  ;;  %s3375_s0 = sld [smem:[#allocation53_spill]] }
  0xf7   :  { %v689_v52 = vmul.f32 %v3370_v43, %v2486_v9  ;;  %v285_v63 = vadd.f32 %v283_v4, %v184_v2  ;;  %v3371_v55 = vstv %s3360_s28  ;;  %v3373_v25 = vstv %s3368_s9  ;;  %s3419_s28 = sld [smem:[#allocation64_spill]]  ;;  %s2841_s9 = sld [smem:[#allocation2 + $0x1b]] }
  0xf8   :  { %v798_v40 = vmul.f32 %v3371_v55, %v2494_v26  ;;  %v694_v51 = vadd.f32 %v692_v8, %v497_v54  ;;  %v916_v46 = vmul.f32 %v3373_v25, %v2566_v57  ;;  %v3374_v29 = vstv %s3361_s30  ;;  %s3424_s30 = sld [smem:[#allocation67_spill]] }
  0xf9   :  { %v691_v59 = vadd.f32 %v689_v52, %v685_v16  ;;  %v802_v5 = vmul.f32 %v3374_v29, %v2510_v14  ;;  %v398_v3 = vadd.f32 %v396_v23, %v285_v63  ;;  %v3377_v13 = vstv %s3362_s5  ;;  %s1440_s5 = smov 16  }
  0xfa   :  { %v911_v28 = vmul.f32 %v3377_v13, %v2529_v30  ;;  %v3378_v2 = vmov %v3373_v25  ;;  %v195_v8 = vadd.f32 %v2042_v45, %v2341_v20  ;;  %v807_v32 = vadd.f32 %v805_v19, %v694_v51 }
  0xfb   :  { %v915_v4 = vmul.f32 %v3378_v2, %v2562_v34  ;;  %v918_v16 = vadd.f32 %v916_v46, %v912_v6  ;;  %v804_v54 = vadd.f32 %v802_v5, %v798_v40  ;;  %v296_v43 = vadd.f32 %v2121_v18, %v2191_v39 }
  0xfc   :  { %v496_v23 = vadd.f32 %v1812_v31, %v398_v3  ;;  %v409_v63 = vadd.f32 %v2440_v49, %v2278_v48  ;;  %v3382_v55 = vstv %s3372_s12  ;;  %v3383_v45 = vstv %s3375_s0  ;;  %s3501_s12 = sld [smem:[#allocation46_spill]]  ;;  %s1445_s0 = smov [#allocation9]  }
  0xfd   :  { %v917_v52 = vadd.f32 %v915_v4, %v911_v28  ;;  %v698_v25 = vmul.f32 %v3382_v55, %v2424_v44  ;;  %v920_v29 = vadd.f32 %v918_v16, %v807_v32  ;;  %v298_v13 = vadd.f32 %v296_v43, %v195_v8 }
  0xfe   :  { %v702_v20 = vmul.f32 %v3383_v45, %v2490_v35  ;;  %v3384_v19 = vstv %s3376_s13  ;;  %v693_v40 = vadd.f32 %v691_v59, %v496_v23  ;;  %v3385_v18 = vstv %s3379_s14  ;;  %s1197_s13 = sshll.u32 %s1445_s0, 4  ;;  %s1198_s13 = int_to_ptr.vmem [resolvable:$true] %s1197_s13 }
  0xff   :  { %v811_v6 = vmul.f32 %v3384_v19, %v2498_v10  ;;  %v815_v31 = vmul.f32 %v3385_v18, %v2514_v15  ;;  %v3386_v39 = vstv %s3380_s15  ;;  %v3387_v49 = vstv %s3381_s1  ;;  %995 = vrot.lane.b32.xlu1 %v920_v29, %s1438_s17  ;;  %s1396_s14 = scalar_lea.vmem %s1198_s13, 256  ;;  %p1401_p6 = scmp.lt.s32.totalorder %s1198_s13, %s1198_s13 }
 0x100   :  { %v924_v48 = vmul.f32 %v3386_v39, %v2533_v36  ;;  %v928_v51 = vmul.f32 %v3387_v49, %v2566_v57  ;;  %v411_v46 = vadd.f32 %v409_v63, %v298_v13  ;;  %v704_v5 = vadd.f32 %v702_v20, %v698_v25  ;;  %p1397_p5 = scmp.ne.s32.totalorder %s1198_s13, %s1396_s14  ;;  %p1402_p7 = scmp.lt.s32.totalorder %s1396_s14, %s1396_s14 }
 0x101   :  { %v194_v59 = vadd.f32 %v2038_v12, %v2337_v1  ;;  %v295_v3 = vadd.f32 %v2117_v24, %v2187_v21  ;;  %v806_v28 = vadd.f32 %v804_v54, %v693_v40  ;;  %v817_v2 = vadd.f32 %v815_v31, %v811_v6 }
 0x102   :  { %v930_v4 = vadd.f32 %v928_v51, %v924_v48  ;;  %v408_v8 = vadd.f32 %v2435_v7, %v2274_v56  ;;  %v523_v32 = vadd.f32 %v1844_v37, %v411_v46  ;;  %v3389_v43 = vmov %v3382_v55  ;;  %p1403_p8 = por %p1402_p7, %p1401_p6 }
 0x103   :  { %v297_v16 = vadd.f32 %v295_v3, %v194_v59  ;;  %v697_v23 = vmul.f32 %v3389_v43, %v2420_v17  ;;  %v3390_v63 = vmov %v3383_v45  ;;  %v919_v1 = vadd.f32 %v917_v52, %v806_v28 }
 0x104   :  { %v701_v12 = vmul.f32 %v3390_v63, %v2486_v9  ;;  %v3391_v24 = vmov %v3384_v19  ;;  %v3392_v54 = vmov %v3385_v18  ;;  %v3393_v25 = vmov %v3386_v39  ;;  %v3410_v63 = vld [vmem:[#allocation93_spill] sm:$0xff]  ;;  %p1404_p9 = pnand %p1403_p8, %p1397_p5 }
 0x105   :  { %v810_v21 = vmul.f32 %v3391_v24, %v2494_v26  ;;  %v814_v55 = vmul.f32 %v3392_v54, %v2510_v14  ;;  %v923_v7 = vmul.f32 %v3393_v25, %v2529_v30  ;;  %v706_v37 = vadd.f32 %v704_v5, %v523_v32  ;;  %993 = vrot.lane.b32.xlu0 %v919_v1, %s1438_s17  ;;  %v3408_v32 = vld [vmem:[#allocation86_spill] sm:$0xff]  ;;  %v3411_v1 = vld [vmem:[#allocation109_spill] sm:$0xff]  ;;  %v3412_v24 = vld [vmem:[#allocation124_spill] sm:$0xff] }
 0x106   :  { %v410_v56 = vadd.f32 %v408_v8, %v297_v16  ;;  %v703_v29 = vadd.f32 %v701_v12, %v697_v23  ;;  %v3397_v13 = vmov %v3387_v49  ;;  %v3398_v52 = vstv %s3388_s18  ;;  %v3409_v23 = vld [vmem:[#allocation100_spill] sm:$0xff]  ;;  %v3413_v54 = vld [vmem:[#allocation66_spill] sm:$0xff] }
 0x107   :  { %v927_v45 = vmul.f32 %v3397_v13, %v2562_v34  ;;  %v2636_v20 = vmul.f32 %v3398_v52, %v2376_v58  ;;  %v205_v19 = vadd.f32 %v2050_v61, %v2349_v60  ;;  %v308_v6 = vadd.f32 %v2129_v38, %v2200_v33 }
 0x108   :  { %v421_v40 = vadd.f32 %v2450_v50, %v2286_v42  ;;  %v819_v18 = vadd.f32 %v817_v2, %v706_v37  ;;  %v522_v31 = vadd.f32 %v1854_v62, %v410_v56  ;;  %v816_v39 = vadd.f32 %v814_v55, %v810_v21 }
 0x109   :  { %v929_v48 = vadd.f32 %v927_v45, %v923_v7  ;;  %v310_v49 = vadd.f32 %v308_v6, %v205_v19  ;;  %v3402_v58 = vstv %s3394_s2  ;;  %v3403_v46 = vstv %s3395_s20 }
 0x10a   :  { %v710_v51 = vmul.f32 %v3402_v58, %v2424_v44  ;;  %v714_v5 = vmul.f32 %v3403_v46, %v2490_v35  ;;  %v3404_v60 = vstv %s3396_s21  ;;  %v932_v38 = vadd.f32 %v930_v4, %v819_v18 }
 0x10b   :  { %v827_v61 = vmul.f32 %v3404_v60, %v2514_v15  ;;  %v705_v33 = vadd.f32 %v703_v29, %v522_v31  ;;  %v3405_v42 = vstv %s3399_s22  ;;  %v3406_v62 = vstv %s3400_s26 }
 0x10c   :  { %v823_v50 = vmul.f32 %v3405_v42, %v2498_v10  ;;  %v940_v59 = vmul.f32 %v3406_v62, %v2566_v57  ;;  %v423_v3 = vadd.f32 %v421_v40, %v310_v49  ;;  %v716_v28 = vadd.f32 %v714_v5, %v710_v51  ;;  %1016 = vrot.lane.b32.xlu1 %v932_v38, %s1439_s11  ;;  %v3423_v51 = vld [vmem:[#allocation88_spill] sm:$0xff] }
 0x10d   :  { %v3407_v2 = vstv %s3401_s7  ;;  %v204_v16 = vadd.f32 %v3408_v32, %v2345_v22  ;;  %v818_v4 = vadd.f32 %v816_v39, %v705_v33  ;;  %v307_v12 = vadd.f32 %v3410_v63, %v3409_v23  ;;  %v3427_v33 = vld [vmem:[#allocation111_spill] sm:$0xff] }
 0x10e   :  { %v936_v8 = vmul.f32 %v3407_v2, %v2533_v36  ;;  %v829_v43 = vadd.f32 %v827_v61, %v823_v50  ;;  %v420_v21 = vadd.f32 %v3412_v24, %v3411_v1  ;;  %v549_v55 = vadd.f32 %v3413_v54, %v423_v3  ;;  %v3426_v61 = vld [vmem:[#allocation95_spill] sm:$0xff] }
 0x10f   :  { %v3414_v7 = vmov %v3402_v58  ;;  %v3415_v22 = vmov %v3403_v46  ;;  %v931_v29 = vadd.f32 %v929_v48, %v818_v4  ;;  %v309_v13 = vadd.f32 %v307_v12, %v204_v16  ;;  %v3422_v58 = vld [vmem:[#allocation119_spill] sm:$0xff] }
 0x110   :  { %v942_v25 = vadd.f32 %v940_v59, %v936_v8  ;;  %v709_v37 = vmul.f32 %v3414_v7, %v2420_v17  ;;  %v713_v56 = vmul.f32 %v3415_v22, %v2486_v9  ;;  %v3417_v45 = vmov %v3405_v42  ;;  %v3435_v22 = vld [vmem:[#allocation118_spill] sm:$0xff] }
 0x111   :  { %v822_v52 = vmul.f32 %v3417_v45, %v2494_v26  ;;  %v3418_v19 = vmov %v3404_v60  ;;  %v718_v40 = vadd.f32 %v716_v28, %v549_v55  ;;  %v3420_v18 = vmov %v3407_v2  ;;  %1014 = vrot.lane.b32.xlu0 %v931_v29, %s1439_s11  ;;  %v3425_v60 = vld [vmem:[#allocation104_spill] sm:$0xff]  ;;  %v3437_v45 = vld [vmem:[#allocation103_spill] sm:$0xff] }
 0x112   :  { %v826_v6 = vmul.f32 %v3418_v19, %v2510_v14  ;;  %v935_v31 = vmul.f32 %v3420_v18, %v2529_v30  ;;  %v3421_v39 = vmov %v3406_v62  ;;  %v225_v48 = vadd.f32 %v3423_v51, %v3422_v58  ;;  %v3429_v2 = vld [vmem:[#allocation68_spill] sm:$0xff] }
 0x113   :  { %v939_v49 = vmul.f32 %v3421_v39, %v2562_v34  ;;  %v422_v46 = vadd.f32 %v420_v21, %v309_v13  ;;  %v715_v5 = vadd.f32 %v713_v56, %v709_v37  ;;  %v332_v38 = vadd.f32 %v3426_v61, %v3425_v60  ;;  %v3436_v56 = vld [vmem:[#allocation87_spill] sm:$0xff] }
 0x114   :  { %v445_v42 = vadd.f32 %v2464_v0, %v3427_v33  ;;  %v831_v50 = vadd.f32 %v829_v43, %v718_v40  ;;  %v828_v62 = vadd.f32 %v826_v6, %v822_v52  ;;  %v3428_v3 = vstv %s3416_s8  ;;  %v3438_v52 = vld [vmem:[#allocation94_spill] sm:$0xff] }
 0x115   :  { %v941_v59 = vadd.f32 %v939_v49, %v935_v31  ;;  %v738_v28 = vmul.f32 %v3428_v3, %v2490_v35  ;;  %v548_v8 = vadd.f32 %v3429_v2, %v422_v46  ;;  %v334_v32 = vadd.f32 %v332_v38, %v225_v48  ;;  %v3439_v6 = vld [vmem:[#allocation110_spill] sm:$0xff]  ;;  %v3440_v31 = vld [vmem:[#allocation69_spill] sm:$0xff] }
 0x116   :  { %v3430_v16 = vstv %s3419_s28  ;;  %v3431_v23 = vstv %s1863_s3  ;;  %v944_v12 = vadd.f32 %v942_v25, %v831_v50  ;;  %v3432_v1 = vstv %s3424_s30  ;;  %v3448_v2 = vld [vmem:[#allocation90_spill] sm:$0xff]  ;;  %s3468_s3 = sld [smem:[#allocation70_spill]] }
 0x117   :  { %v734_v4 = vmul.f32 %v3430_v16, %v2424_v44  ;;  %v851_v63 = vmul.f32 %v3431_v23, %v2514_v15  ;;  %v847_v0 = vmul.f32 %v3432_v1, %v2498_v10  ;;  %v3433_v43 = vstv %s1867_s23  ;;  %s3478_s23 = sld [smem:[#allocation74_spill]] }
 0x118   :  { %v960_v24 = vmul.f32 %v3433_v43, %v2533_v36  ;;  %v3434_v21 = vstv %s1877_s29  ;;  %v717_v55 = vadd.f32 %v715_v5, %v548_v8  ;;  %v447_v7 = vadd.f32 %v445_v42, %v334_v32  ;;  %1039 = vrot.lane.b32.xlu1 %v944_v12, %s1440_s5  ;;  %s1441_s29 = smov 112  }
 0x119   :  { %v964_v54 = vmul.f32 %v3434_v21, %v2566_v57  ;;  %v740_v37 = vadd.f32 %v738_v28, %v734_v4  ;;  %v224_v25 = vadd.f32 %v3436_v56, %v3435_v22  ;;  %v853_v29 = vadd.f32 %v851_v63, %v847_v0  ;;  %v3447_v28 = vld [vmem:[#allocation121_spill] sm:$0xff] }
 0x11a   :  { %v331_v19 = vadd.f32 %v3438_v52, %v3437_v45  ;;  %v444_v40 = vadd.f32 %v2459_v41, %v3439_v6  ;;  %v830_v18 = vadd.f32 %v828_v62, %v717_v55  ;;  %v601_v39 = vadd.f32 %v3440_v31, %v447_v7  ;;  %v3450_v63 = vld [vmem:[#allocation97_spill] sm:$0xff]  ;;  %v3454_v55 = vld [vmem:[#allocation73_spill] sm:$0xff] }
 0x11b   :  { %v966_v13 = vadd.f32 %v964_v54, %v960_v24  ;;  %v3441_v49 = vmov %v3430_v16  ;;  %v3442_v51 = vmov %v3428_v3  ;;  %v3443_v5 = vmov %v3432_v1 }
 0x11c   :  { %v733_v58 = vmul.f32 %v3441_v49, %v2420_v17  ;;  %v737_v48 = vmul.f32 %v3442_v51, %v2486_v9  ;;  %v333_v46 = vadd.f32 %v331_v19, %v224_v25  ;;  %v846_v60 = vmul.f32 %v3443_v5, %v2494_v26  ;;  %v3459_v49 = vld [vmem:[#allocation120_spill] sm:$0xff]  ;;  %v3462_v5 = vld [vmem:[#allocation105_spill] sm:$0xff] }
 0x11d   :  { %v3444_v61 = vmov %v3431_v23  ;;  %v3445_v41 = vmov %v3434_v21  ;;  %v943_v42 = vadd.f32 %v941_v59, %v830_v18  ;;  %v742_v50 = vadd.f32 %v740_v37, %v601_v39  ;;  %v3449_v23 = vld [vmem:[#allocation106_spill] sm:$0xff]  ;;  %v3451_v59 = vld [vmem:[#allocation113_spill] sm:$0xff] }
 0x11e   :  { %v850_v38 = vmul.f32 %v3444_v61, %v2510_v14  ;;  %v963_v33 = vmul.f32 %v3445_v41, %v2562_v34  ;;  %v3446_v62 = vmov %v3433_v43  ;;  %v235_v8 = vadd.f32 %v3448_v2, %v3447_v28 }
 0x11f   :  { %v959_v3 = vmul.f32 %v3446_v62, %v2529_v30  ;;  %v446_v32 = vadd.f32 %v444_v40, %v333_v46  ;;  %v739_v16 = vadd.f32 %v737_v48, %v733_v58  ;;  %v344_v12 = vadd.f32 %v3450_v63, %v3449_v23  ;;  %1037 = vrot.lane.b32.xlu0 %v943_v42, %s1440_s5  ;;  %v3460_v58 = vld [vmem:[#allocation89_spill] sm:$0xff]  ;;  %v3465_v42 = vld [vmem:[#allocation75_spill] sm:$0xff] }
 0x120   :  { %v852_v4 = vadd.f32 %v850_v38, %v846_v60  ;;  %v855_v1 = vadd.f32 %v853_v29, %v742_v50  ;;  %v457_v0 = vadd.f32 %v2478_v47, %v3451_v59  ;;  %v3452_v43 = vstv %s1879_s10  ;;  %v3463_v60 = vld [vmem:[#allocation96_spill] sm:$0xff]  ;;  %v3472_v59 = vld [vmem:[#allocation123_spill] sm:$0xff]  ;;  %s3475_s10 = sld [smem:[#allocation71_spill]] }
 0x121   :  { %v746_v24 = vmul.f32 %v3452_v43, %v2424_v44  ;;  %v3453_v21 = vstv %s1887_s16  ;;  %v600_v7 = vadd.f32 %v3454_v55, %v446_v32  ;;  %v965_v37 = vadd.f32 %v963_v33, %v959_v3  ;;  %v3464_v38 = vld [vmem:[#allocation112_spill] sm:$0xff]  ;;  %s1442_s16 = smov 96  }
 0x122   :  { %v750_v54 = vmul.f32 %v3453_v21, %v2490_v35  ;;  %v346_v22 = vadd.f32 %v344_v12, %v235_v8  ;;  %v3455_v56 = vstv %s1904_s25  ;;  %v968_v45 = vadd.f32 %v966_v13, %v855_v1  ;;  %s3483_s25 = sld [smem:[#allocation72_spill]] }
 0x123   :  { %v863_v25 = vmul.f32 %v3455_v56, %v2514_v15  ;;  %v3456_v29 = vstv %s1889_s6  ;;  %v3457_v47 = vstv %s1922_s4  ;;  %v741_v40 = vadd.f32 %v739_v16, %v600_v7  ;;  %v3476_v7 = vld [vmem:[#allocation108_spill] sm:$0xff]  ;;  %s2829_s6 = sld [smem:[#allocation2 + $0x1a]]  ;;  %s2839_s4 = sld [smem:[#allocation2 + $0x4b]] }
 0x124   :  { %v752_v52 = vadd.f32 %v750_v54, %v746_v24  ;;  %v859_v19 = vmul.f32 %v3456_v29, %v2498_v10  ;;  %v976_v6 = vmul.f32 %v3457_v47, %v2566_v57  ;;  %v459_v18 = vadd.f32 %v457_v0, %v346_v22  ;;  %1064 = vrot.lane.b32.xlu1 %v968_v45, %s1441_s29  ;;  %v3473_v0 = vld [vmem:[#allocation92_spill] sm:$0xff]  ;;  %v3477_v22 = vld [vmem:[#allocation99_spill] sm:$0xff] }
 0x125   :  { %v3458_v31 = vstv %s1906_s24  ;;  %v234_v51 = vadd.f32 %v3460_v58, %v3459_v49  ;;  %v3461_v13 = vstv %s3388_s18  ;;  %v343_v61 = vadd.f32 %v3463_v60, %v3462_v5  ;;  %s2806_s24 = sld [smem:[#allocation2 + $0x19]] }
 0x126   :  { %v972_v39 = vmul.f32 %v3458_v31, %v2533_v36  ;;  %v467_v48 = vmul.f32 %v3461_v13, %v2380_v53  ;;  %v865_v46 = vadd.f32 %v863_v25, %v859_v19  ;;  %v456_v41 = vadd.f32 %v2473_v27, %v3464_v38  ;;  %v3479_v25 = vld [vmem:[#allocation115_spill] sm:$0xff] }
 0x127   :  { %v854_v33 = vadd.f32 %v852_v4, %v741_v40  ;;  %v627_v50 = vadd.f32 %v3465_v42, %v459_v18  ;;  %v3466_v3 = vmov %v3453_v21  ;;  %v345_v53 = vadd.f32 %v343_v61, %v234_v51 }
 0x128   :  { %v978_v62 = vadd.f32 %v976_v6, %v972_v39  ;;  %v749_v28 = vmul.f32 %v3466_v3, %v2486_v9  ;;  %v3467_v2 = vmov %v3452_v43  ;;  %v3469_v32 = vmov %v3456_v29  ;;  %v3482_v6 = vld [vmem:[#allocation76_spill] sm:$0xff]  ;;  %v3490_v3 = vld [vmem:[#allocation107_spill] sm:$0xff] }
 0x129   :  { %v745_v8 = vmul.f32 %v3467_v2, %v2420_v17  ;;  %v858_v16 = vmul.f32 %v3469_v32, %v2494_v26  ;;  %v3470_v23 = vmov %v3455_v56  ;;  %v967_v27 = vadd.f32 %v965_v37, %v854_v33  ;;  %v3488_v33 = vld [vmem:[#allocation91_spill] sm:$0xff]  ;;  %v3492_v2 = vld [vmem:[#allocation114_spill] sm:$0xff] }
 0x12a   :  { %v862_v63 = vmul.f32 %v3470_v23, %v2510_v14  ;;  %v754_v4 = vadd.f32 %v752_v52, %v627_v50  ;;  %v3471_v12 = vmov %v3457_v47  ;;  %v245_v43 = vadd.f32 %v3473_v0, %v3472_v59  ;;  %v3493_v32 = vld [vmem:[#allocation79_spill] sm:$0xff] }
 0x12b   :  { %v975_v1 = vmul.f32 %v3471_v12, %v2562_v34  ;;  %v458_v24 = vadd.f32 %v456_v41, %v345_v53  ;;  %v751_v21 = vadd.f32 %v749_v28, %v745_v8  ;;  %v3474_v54 = vmov %v3458_v31  ;;  %1062 = vrot.lane.b32.xlu0 %v967_v27, %s1441_s29  ;;  %v3487_v41 = vld [vmem:[#allocation122_spill] sm:$0xff]  ;;  %v3495_v27 = vld [vmem:[#allocation77_spill] sm:$0xff] }
 0x12c   :  { %v971_v55 = vmul.f32 %v3474_v54, %v2529_v30  ;;  %v356_v56 = vadd.f32 %v3477_v22, %v3476_v7  ;;  %v867_v37 = vadd.f32 %v865_v46, %v754_v4  ;;  %v469_v45 = vadd.f32 %v467_v48, %v3479_v25  ;;  %v3491_v28 = vld [vmem:[#allocation98_spill] sm:$0xff]  ;;  %v3499_v54 = vld [vmem:[#allocation80_spill] sm:$0xff]  ;;  %v3502_v25 = vld [vmem:[#allocation81_spill] sm:$0xff] }
 0x12d   :  { %v3480_v52 = vstv %s1928_s27  ;;  %v3481_v19 = vstv %s3468_s3  ;;  %v626_v40 = vadd.f32 %v3482_v6, %v458_v24  ;;  %v864_v18 = vadd.f32 %v862_v63, %v858_v16  ;;  %v3494_v16 = vld [vmem:[#allocation82_spill] sm:$0xff]  ;;  %s2845_s27 = sld [smem:[#allocation2 + $0x4c]] }
 0x12e   :  { %v758_v29 = vmul.f32 %v3480_v52, %v2424_v44  ;;  %v762_v47 = vmul.f32 %v3481_v19, %v2490_v35  ;;  %v358_v31 = vadd.f32 %v356_v56, %v245_v43  ;;  %v3484_v39 = vstv %s1940_s19  ;;  %s1443_s19 = smov 80  }
 0x12f   :  { %v875_v49 = vmul.f32 %v3484_v39, %v2514_v15  ;;  %v980_v58 = vadd.f32 %v978_v62, %v867_v37  ;;  %v977_v51 = vadd.f32 %v975_v1, %v971_v55  ;;  %v3485_v48 = vstv %s3475_s10  ;;  %v3500_v55 = vld [vmem:[#allocation83_spill] sm:$0xff] }
 0x130   :  { %v764_v13 = vadd.f32 %v762_v47, %v758_v29  ;;  %v871_v46 = vmul.f32 %v3485_v48, %v2498_v10  ;;  %v753_v5 = vadd.f32 %v751_v21, %v626_v40  ;;  %v471_v60 = vadd.f32 %v469_v45, %v358_v31  ;;  %v3503_v45 = vld [vmem:[#allocation84_spill] sm:$0xff] }
 0x131   :  { %v3486_v61 = vstv %s3478_s23  ;;  %v244_v42 = vadd.f32 %v3488_v33, %v3487_v41  ;;  %1087 = vrot.lane.b32.xlu1 %v980_v58, %s1442_s16  ;;  %v3489_v50 = vstv %s3483_s25  ;;  %v355_v53 = vadd.f32 %v3491_v28, %v3490_v3 }
 0x132   :  { %v988_v38 = vmul.f32 %v3486_v61, %v2566_v57  ;;  %v984_v62 = vmul.f32 %v3489_v50, %v2533_v36  ;;  %v468_v8 = vadd.f32 %v2636_v20, %v3492_v2  ;;  %v563_v23 = vadd.f32 %v3494_v16, %v3493_v32  ;;  %v3513_v32 = vld [vmem:[#allocation117_spill] sm:$0xff]  ;;  %v3514_v16 = vld [vmem:[#allocation102_spill] sm:$0xff] }
 0x133   :  { %v866_v63 = vadd.f32 %v864_v18, %v753_v5  ;;  %v653_v4 = vadd.f32 %v3495_v27, %v471_v60  ;;  %v877_v12 = vadd.f32 %v875_v49, %v871_v46  ;;  %v3496_v1 = vmov %v3481_v19  ;;  %v3506_v49 = vld [vmem:[#allocation78_spill] sm:$0xff] }
 0x134   :  { %v761_v59 = vmul.f32 %v3496_v1, %v2486_v9  ;;  %v357_v0 = vadd.f32 %v355_v53, %v244_v42  ;;  %v3497_v43 = vmov %v3480_v52  ;;  %v3498_v20 = vmov %v3484_v39  ;;  %v3510_v42 = vld [vmem:[#allocation85_spill] sm:$0xff] }
 0x135   :  { %v757_v24 = vmul.f32 %v3497_v43, %v2420_v17  ;;  %v874_v21 = vmul.f32 %v3498_v20, %v2510_v14  ;;  %v564_v7 = vadd.f32 %v3500_v55, %v3499_v54  ;;  %v979_v22 = vadd.f32 %v977_v51, %v866_v63  ;;  %v3512_v53 = vld [vmem:[#allocation101_spill] sm:$0xff]  ;;  %v3516_v43 = vld [vmem:[#allocation126_spill] sm:$0xff] }
 0x136   :  { %v766_v56 = vadd.f32 %v764_v13, %v653_v4  ;;  %v990_v37 = vadd.f32 %v988_v38, %v984_v62  ;;  %v565_v52 = vadd.f32 %v3503_v45, %v3502_v25  ;;  %v470_v29 = vadd.f32 %v468_v8, %v357_v0 }
 0x137   :  { %v763_v19 = vadd.f32 %v761_v59, %v757_v24  ;;  %v3504_v47 = vmov %v3485_v48  ;;  %v3505_v40 = vmov %v3486_v61  ;;  %1085 = vrot.lane.b32.xlu0 %v979_v22, %s1442_s16  ;;  %v720_v39 = vstv %s2806_s24 }
 0x138   :  { %v870_v6 = vmul.f32 %v3504_v47, %v2494_v26  ;;  %v987_v18 = vmul.f32 %v3505_v40, %v2562_v34  ;;  %v879_v31 = vadd.f32 %v877_v12, %v766_v56  ;;  %v652_v58 = vadd.f32 %v3506_v49, %v470_v29  ;;  %v3515_v12 = vld [vmem:[#allocation125_spill] sm:$0xff] }
 0x139   :  { %v3507_v13 = vmov %v3489_v50  ;;  %v3508_v46 = vstv %s3501_s12  ;;  %v570_v50 = vsel %vm133_vm1, %v564_v7, %v3510_v42  ;;  %v571_v62 = vsel %vm133_vm1, %v565_v52, %v563_v23 }
 0x13a   :  { %v876_v51 = vadd.f32 %v874_v21, %v870_v6  ;;  %v983_v48 = vmul.f32 %v3507_v13, %v2529_v30  ;;  %v725_v5 = vmul.f32 %v3508_v46, %v2486_v9  ;;  %v3509_v60 = vmov %v3508_v46  ;;  %v3511_v9 = vld [vmem:[#allocation116_spill] sm:$0xff] }
 0x13b   :  { %v726_v61 = vmul.f32 %v3509_v60, %v2490_v35  ;;  %v992_v38 = vadd.f32 %v990_v37, %v879_v31  ;;  %v765_v41 = vadd.f32 %v763_v19, %v652_v58  ;;  %v721_v3 = vmul.f32 %v720_v39, %v2420_v17  ;;  %v3518_v58 = vld [vmem:[#allocation29_spill] sm:$0xff] }
 0x13c   :  { %v989_v33 = vadd.f32 %v987_v18, %v983_v48  ;;  %v722_v28 = vmul.f32 %v720_v39, %v2424_v44  ;;  %v321_v2 = vadd.f32 %v3512_v53, %v3511_v9  ;;  %v833_v8 = vstv %s2829_s6  ;;  %v125_v18 = vld [vmem:[#allocation6] ss:$2 sm:$0x3]  ;;  %v3519_v48 = vld [vmem:[#allocation31_spill] sm:$0xff] }
 0x13d   :  { %1110 = vrot.lane.b32.xlu1 %v992_v38, %s1443_s19  ;;  %v878_v35 = vadd.f32 %v876_v51, %v765_v41  ;;  %v322_v63 = vadd.f32 %v3514_v16, %v3513_v32  ;;  %v837_v27 = vstv %s2839_s4  ;;  %v946_v4 = vstv %s2841_s9 }
 0x13e   :  { %v434_v1 = vadd.f32 %v3515_v12, %v321_v2  ;;  %v727_v59 = vadd.f32 %v725_v5, %v721_v3  ;;  %v728_v23 = vadd.f32 %v726_v61, %v722_v28  ;;  %v950_v0 = vstv %s2845_s27 }
 0x13f   :  { %v991_v17 = vadd.f32 %v989_v33, %v878_v35  ;;  %v435_v44 = vadd.f32 %v3516_v43, %v322_v63  ;;  %v834_v24 = vmul.f32 %v833_v8, %v2494_v26  ;;  %v835_v21 = vmul.f32 %v833_v8, %v2498_v10 }
 0x140   :  { %v574_v20 = vadd.f32 %v570_v50, %v434_v1  ;;  %v838_v54 = vmul.f32 %v837_v27, %v2510_v14  ;;  %v839_v55 = vmul.f32 %v837_v27, %v2514_v15  ;;  %v947_v22 = vmul.f32 %v946_v4, %v2529_v30 }
 0x141   :  { %1108 = vrot.lane.b32.xlu0 %v991_v17, %s1443_s19  ;;  %v575_v7 = vadd.f32 %v571_v62, %v435_v44  ;;  %v948_v56 = vmul.f32 %v946_v4, %v2533_v36  ;;  %v951_v37 = vmul.f32 %v950_v0, %v2562_v34  ;;  %v952_v26 = vmul.f32 %v950_v0, %v2566_v57 }
 0x142   :  { %v729_v25 = vadd.f32 %v727_v59, %v574_v20  ;;  %v840_v45 = vadd.f32 %v838_v54, %v834_v24  ;;  %v841_v52 = vadd.f32 %v839_v55, %v835_v21  ;;  %vm1000_vm1 = vcmp.ge.s32.totalorder %v125_v18, 3 }
 0x143   :  { %v730_v29 = vadd.f32 %v728_v23, %v575_v7  ;;  %v953_v19 = vadd.f32 %v951_v37, %v947_v22  ;;  %v954_v47 = vadd.f32 %v952_v26, %v948_v56  ;;  %vm1021_vm11 = vcmp.ge.s32.totalorder %v125_v18, 2 }
 0x144   :  { %v842_v10 = vadd.f32 %v840_v45, %v729_v25  ;;  %vm1044_vm12 = vcmp.ge.s32.totalorder %v125_v18, 1  ;;  %v3517_v31 = vmov 0   ;;  %vm1018_vm13 = vcmp.lt.s32.totalorder %v1618_v11, 32 }
 0x145   :  { %v843_v14 = vadd.f32 %v841_v52, %v730_v29  ;;  %v1001_v39 = vsel %vm1000_vm1, 1, %v3517_v31  ;;  %v1022_v57 = vsel %vm1021_vm11, 1, %v3517_v31  ;;  %v1045_v49 = vsel %vm1044_vm12, 1, %v3517_v31 }
 0x146   :  { %v2887_v6 = vadd.f32 %v953_v19, %v842_v10  ;;  %v1005_v51 = vrot.slane %v1001_v39, %v3518_v58  ;;  %v1026_v13 = vrot.slane %v1022_v57, %v3518_v58  ;;  %v1030_v46 = vrot.slane %v1022_v57, %v3519_v48 }
 0x147   :  { %v2889_v15 = vadd.f32 %v954_v47, %v843_v14  ;;  %v1009_v5 = vrot.slane %v1001_v39, %v3519_v48  ;;  %v1049_v61 = vrot.slane %v1045_v49, %v3518_v58  ;;  %v1053_v38 = vrot.slane %v1045_v49, %v3519_v48 }
 0x148   :  { %vm997_vm14 = vcmp.lt.s32.totalorder %v1618_v11, 48  ;;  %vm2902_vm15 = vcmp.eq.s32.totalorder %v1005_v51, 1  ;;  %vm2906_vm0 = vcmp.eq.s32.totalorder %v1026_v13, 1  ;;  %vm1041_vm2 = vcmp.lt.s32.totalorder %v1618_v11, 16 }
 0x149   :  { %vm2911_vm3 = vcmp.eq.s32.totalorder %v1030_v46, 1  ;;  %vm1069_vm4 = vcmp.lt.s32.totalorder %v125_v18, 15  ;;  %vm2915_vm5 = vcmp.eq.s32.totalorder %v1009_v5, 1  ;;  %vm2919_vm6 = vcmp.eq.s32.totalorder %v1049_v61, 1 }
 0x14a   :  { %vm2923_vm7 = vcmp.eq.s32.totalorder %v1053_v38, 1  ;;  %vm1092_vm8 = vcmp.lt.s32.totalorder %v125_v18, 14  ;;  %v1070_v4 = vsel %vm1069_vm4, 1, %v3517_v31  ;;  %vm1115_vm9 = vcmp.lt.s32.totalorder %v125_v18, 13 }
 0x14b   :  { %v1093_v1 = vsel %vm1092_vm8, 1, %v3517_v31  ;;  %v1074_v24 = vrot.slane %v1070_v4, %v3518_v58  ;;  %v1078_v20 = vrot.slane %v1070_v4, %v3519_v48  ;;  %vm1066_vm10 = vcmp.lt.s32.totalorder %v1618_v11, 112 }
 0x14c   :  { %v1097_v21 = vrot.slane %v1093_v1, %v3518_v58  ;;  %v1101_v54 = vrot.slane %v1093_v1, %v3519_v48  ;;  %v1116_v22 = vsel %vm1115_vm9, 1, %v3517_v31  ;;  %vm1089_vm1 = vcmp.lt.s32.totalorder %v1618_v11, 96 }
 0x14d   :  { %vm2948_vm11 = vcmp.eq.s32.totalorder %v1074_v24, 1  ;;  %vm2952_vm12 = vcmp.eq.s32.totalorder %v1078_v20, 1  ;;  %v1120_v10 = vrot.slane %v1116_v22, %v3518_v58  ;;  %v1124_v47 = vrot.slane %v1116_v22, %v3519_v48  ;;  %v1341_v20 = vld [vmem:[#allocation7 + $0x8] sm:$0xff] }
 0x14e   :  { %v1444_v28 = vmov 1966171168  }
 0x14f   :  { %v1147_v9 = vunpack.c.l.s4 %v1444_v28 }
 0x151   :  { %v1148_v53 = vunpack.c.0.s8 %v1147_v9 }
 0x171   :  { %v996_v40 = vpop.permute.xlu1 %995 }
 0x177   :  { %v994_v30 = vpop.permute.xlu0 %993 }
 0x178   :  { %v998_v2 = vsel %vm997_vm14, %v994_v30, %v996_v40  ;;  %v999_v8 = vsel %vm997_vm14, %v996_v40, %v994_v30  ;;  %vm2960_vm14 = vcmp.eq.s32.totalorder %v1101_v54, 1 }
 0x179   :  { %v1012_v59 = vsel %vm2902_vm15, %v999_v8, 0.0  ;;  %v1013_v23 = vsel %vm2915_vm5, %v998_v2, 0.0  ;;  %vm1112_vm15 = vcmp.lt.s32.totalorder %v1618_v11, 80  ;;  %v3540_v8 = vld [vmem:[#allocation26_spill] sm:$0xff] }
 0x17e   :  { %v1017_v36 = vpop.permute.xlu1 %1016 }
 0x183   :  { %v1015_v34 = vpop.permute.xlu0 %1014 }
 0x184   :  { %v1019_v62 = vsel %vm1018_vm13, %v1015_v34, %v1017_v36  ;;  %v1020_v3 = vsel %vm1018_vm13, %v1017_v36, %v1015_v34  ;;  %vm2956_vm13 = vcmp.eq.s32.totalorder %v1097_v21, 1 }
 0x185   :  { %v1033_v16 = vsel %vm2906_vm0, %v1020_v3, 0.0  ;;  %v1034_v63 = vsel %vm2911_vm3, %v1019_v62, 0.0  ;;  %vm1125_vm0 = vcmp.eq.s32.totalorder %v1120_v10, 1 }
 0x186   :  { %v1035_v43 = vadd.f32 %v1033_v16, %v1012_v59  ;;  %v1036_v44 = vadd.f32 %v1034_v63, %v1013_v23 }
 0x18a   :  { %v1040_v60 = vpop.permute.xlu1 %1039 }
 0x191   :  { %v1038_v41 = vpop.permute.xlu0 %1037 }
 0x192   :  { %v1042_v35 = vsel %vm1041_vm2, %v1038_v41, %v1040_v60  ;;  %v1043_v32 = vsel %vm1041_vm2, %v1040_v60, %v1038_v41  ;;  %vm1126_vm2 = vcmp.eq.s32.totalorder %v1124_v47, 1 }
 0x193   :  { %v1056_v0 = vsel %vm2919_vm6, %v1043_v32, 0.0  ;;  %v1057_v17 = vsel %vm2923_vm7, %v1042_v35, 0.0  ;;  %v1151_v35 = vsub.s32 %v1148_v53, %v3540_v8 }
 0x194   :  { %v1058_v55 = vadd.f32 %v1056_v0, %v1035_v43  ;;  %v1059_v7 = vadd.f32 %v1057_v17, %v1036_v44  ;;  %v1340_v44 = vld [vmem:[#allocation7] sm:$0xff] }
 0x196   :  { %v1065_v27 = vpop.permute.xlu1 %1064  ;;  %v1060_v14 = vadd.f32 %v1058_v55, %v2887_v6  ;;  %v1061_v40 = vadd.f32 %v1059_v7, %v2889_v15 }
 0x19d   :  { %v1063_v12 = vpop.permute.xlu0 %1062 }
 0x19e   :  { %v1067_v52 = vsel %vm1066_vm10, %v1063_v12, %v1065_v27  ;;  %v1068_v26 = vsel %vm1066_vm10, %v1065_v27, %v1063_v12 }
 0x19f   :  { %v1081_v36 = vsel %vm2948_vm11, %v1067_v52, 0.0  ;;  %v1082_v34 = vsel %vm2952_vm12, %v1068_v26, 0.0 }
 0x1a0   :  { %v1083_v6 = vadd.f32 %v1081_v36, %v1060_v14  ;;  %v1084_v49 = vadd.f32 %v1082_v34, %v1061_v40 }
 0x1a3   :  { %v1088_v56 = vpop.permute.xlu1 %1087 }
 0x1a9   :  { %v1086_v37 = vpop.permute.xlu0 %1085 }
 0x1aa   :  { %v1090_v30 = vsel %vm1089_vm1, %v1086_v37, %v1088_v56  ;;  %v1091_v18 = vsel %vm1089_vm1, %v1088_v56, %v1086_v37 }
 0x1ab   :  { %v1104_v31 = vsel %vm2956_vm13, %v1090_v30, 0.0  ;;  %v1105_v39 = vsel %vm2960_vm14, %v1091_v18, 0.0 }
 0x1ac   :  { %v1106_v51 = vadd.f32 %v1104_v31, %v1083_v6  ;;  %v1107_v13 = vadd.f32 %v1105_v39, %v1084_v49 }
 0x1af   :  { %v1111_v57 = vpop.permute.xlu1 %1110 }
 0x1b3   :  { %v1109_v15 = vpop.permute.xlu0 %1108 }
 0x1b4   :  { %v1113_v46 = vsel %vm1112_vm15, %v1109_v15, %v1111_v57  ;;  %v1114_v5 = vsel %vm1112_vm15, %v1111_v57, %v1109_v15 }
 0x1b5   :  { %v1127_v60 = vsel %vm1125_vm0, %v1113_v46, 0.0  ;;  %v1128_v61 = vsel %vm1126_vm2, %v1114_v5, 0.0 }
 0x1b6   :  { %v1129_v38 = vadd.f32 %v1127_v60, %v1106_v51  ;;  %v1130_v41 = vadd.f32 %v1128_v61, %v1107_v13 }
 0x1b8   :  { %v1308_v33 = vmul.f32 -1.442695, %v1129_v38  ;;  %v1309_v42 = vmul.f32 -1.442695, %v1130_v41 }
 0x1ba   :  { %1332 = vpow2.f32 %v1308_v33 }
 0x1bb   :  { %1334 = vpow2.f32 %v1309_v42 }
 0x1c4   :  { %v1333_v50 = vpop.eup %1332 }
 0x1c5   :  { %v1335_v62 = vpop.eup %1334  ;;  %v1137_v11 = vadd.f32 1.0, %v1333_v50 }
 0x1c6   :  { %v1138_v3 = vadd.f32 1.0, %v1335_v62 }
 0x1c7   :  { %1336 = vrcp.f32 %v1137_v11 }
 0x1c8   :  { %1338 = vrcp.f32 %v1138_v3 }
 0x1d1   :  { %v1337_v2 = vpop.eup %1336 }
 0x1d2   :  { %v1339_v32 = vpop.eup %1338 }
 0x1d3   :  { %v1145_v16 = vcombine.low %v1337_v2, %v1339_v32 }
 0x1d5   :  { %v1152_v63 = vrot.slane %v1145_v16, %v1151_v35 }
 0x1d7   :  { %v1153_v27 = vcombine.high %v1152_v63, %v1152_v63  ;;  %v1160_v4 = vrot.slane %v1152_v63, %v1151_v35 }
 0x1d9   :  { %v1167_v12 = vrot.slane %v1153_v27, %v1151_v35  ;;  %v1171_v1 = vrot.slane %v1160_v4, %v3518_v58  ;;  %v1175_v59 = vrot.slane %v1160_v4, %v3519_v48 }
 0x1db   :  { %v1179_v23 = vrot.slane %v1167_v12, %v3518_v58  ;;  %v1183_v0 = vrot.slane %v1167_v12, %v3519_v48  ;;  %v1184_v17 = vcombine.low %v1171_v1, %v1175_v59 }
 0x1dd   :  { %v1185_v43 = vcombine.low %v1179_v23, %v1183_v0  ;;  %v1188_v24 = vmul.f32 %v1340_v44, %v1184_v17 }
 0x1df   :  { %v1189_v21 = vmul.f32 %v1341_v20, %v1185_v43  ;;  %1190 = vst [vmem:[#allocation9] sm:$0xff] %v1188_v24 }
 0x1e1   :  { %1191 = vst [vmem:[#allocation9 + $0x8] sm:$0xff] %v1189_v21 }
 0x1e2   :  { %1407 = shalt.err (!%p1404_p9)
}
 0x1e3   :  { %s3541_s17 = sld [smem:[#allocation127_spill]] }
 0x1e9   :  { %s1408_s18 = scalar_lea.hbm %s3541_s17, 256 }
 0x1ea   :  { %p1409_p10 = scmp.ne.s32.totalorder %s3541_s17, %s1408_s18  ;;  %p1412_p11 = scmp.lt.u32.totalorder %s1408_s18, %s3541_s17 }
 0x1ec   :  { %p1414_p12 = pnand %p1412_p11, %p1409_p10 }
 0x1ee   :  { %1417 = shalt.err (!%p1414_p12)
}
 0x1ef   :  { %s3542_s26 = smov 8   ;;  %s3543_s7 = smov 128  }
 0x1f0   :  { %1203 = dma.vmem_to_hbm [thread:$0]  %s1198_s13, 256, %s3541_s17, [#allocation4], %s3543_s7, %s3543_s7, %s3542_s26  }
 0x1f1   :  { %1424 = dma.done.wait [#allocation4], 256  }
 0x1f2   :  { %1425 = vsyncadd [#allocation4], 4294967040 }
 0x1f3   :  { %1207 = vsyncpa [#allocation3], 1 }
 0x1f4   :  { %1208 = vsyncpa [#allocation8], 1 }
 0x1f5   :  { %1209 = vsyncpa [#allocation4], 1 }
 0x1f6   :  { %1210 = vsyncpa [#allocation5], 1 }

</bundles_post_ra>
